<compile_context>
chip_gen: v5e
topology: v5e:2x2
jax: 0.10.0
libtpu: 0.0.40
codegen_flags: <defaults>
</compile_context>

<pallas_src>
import jax
import jax.numpy as jnp
from jax.experimental import pallas as pl
from jax.experimental.pallas import tpu as pltpu

LANE = 128


def _round_up(x, m):
    return (x + m - 1) // m * m


def gru_kernel(x_ref,      # (S, B, I_pad)   time-major, lane-padded input
               w_i_ref,    # (I_pad, 3*H_pad)  [W_ir | W_iz | W_in], zero-padded
               w_h_ref,    # (H_pad, 3*H_pad)  [W_hr | W_hz | W_hn], zero-padded
               b_i_ref,    # (1, 3*H_pad)      [b_ir+b_hr | b_iz+b_hz | b_in]
               b_hn_ref,   # (1, H_pad)        b_hn (stays hidden-side: r*(.))
               w_fc_ref,   # (H_pad, LANE)     col 0 = fc weight, rest zero
               b_fc_ref,   # (1, LANE)         col 0 = fc bias,   rest zero
               out_ref):   # (B, LANE)         col 0 = fc output
    S, B, Ip = x_ref.shape
    Hp = w_h_ref.shape[0]
    mm_dtype = w_h_ref.dtype   # matmul operand dtype (bf16 default, f32 opt.)

    # ---- Phase 1: hoisted input projections (one well-shaped MXU matmul) ----
    # NOTE: this reshape is a free relayout only when B is a multiple of 8
    # (sublane); other B silently insert a VMEM copy (perf hazard only).
    x_all = x_ref[...].reshape(S * B, Ip)
    gi_all = jnp.dot(x_all, w_i_ref[...],
                     preferred_element_type=jnp.float32) + b_i_ref[...]

    w_h = w_h_ref[...]
    # Hoisted broadcast: JAX does not CSE broadcast_in_dim, so do it once.
    b_hn = jnp.broadcast_to(b_hn_ref[...], (B, Hp)).astype(jnp.float32)

    # ---- Phase 2: serial recurrence, h carried in vregs, statically unrolled.
    # (S is small; unrolling gives the scheduler visibility across steps.)
    # TODO(synk): if the Mosaic dump shows the (Hp, 3*Hp) weight push is NOT
    # hoisted across the unrolled steps, drive the MXU explicitly
    # (pltpu.matmul_push_rhs once + matmul_acc_lhs / matmul_pop per step) to
    # keep W_h resident in the weight registers for the whole recurrence.
    # TODO(synk): for large S, switch to lax.fori_loop(..., unroll=4/8) with
    # h as the carry and pl.ds-indexed gi chunks (bounds vreg live ranges).
    h = jnp.zeros((B, Hp), jnp.float32)
    for t in range(S):
        gi = gi_all[t * B:(t + 1) * B, :]                   # (B, 3*Hp)
        gh = jnp.dot(h.astype(mm_dtype), w_h,
                     preferred_element_type=jnp.float32)    # (B, 3*Hp)
        # Gate slices are at multiples of Hp (multiple of 128) -> lane-aligned.
        r = jax.nn.sigmoid(gi[:, 0 * Hp:1 * Hp] + gh[:, 0 * Hp:1 * Hp])
        z = jax.nn.sigmoid(gi[:, 1 * Hp:2 * Hp] + gh[:, 1 * Hp:2 * Hp])
        n = jnp.tanh(gi[:, 2 * Hp:3 * Hp] + r * (gh[:, 2 * Hp:3 * Hp] + b_hn))
        h = n + z * (h - n)           # == (1-z)*n + z*h, one fewer VPU mul

    # ---- Final linear layer, lane-dense padded output ----
    y = jnp.dot(h.astype(mm_dtype), w_fc_ref[...],
                preferred_element_type=jnp.float32) + b_fc_ref[...]
    out_ref[...] = y.astype(out_ref.dtype)


def pack_params(params, matmul_dtype=jnp.bfloat16):
    """Pack GRU + fc params into lane-dense, zero-padded slabs.

    Run ONCE (or cache on param identity); the packed tuple is what the
    per-call forward consumes.  matmul_dtype=bf16 is the default on all TPU
    generations (f32 accumulation + f32 elementwise gate math are kept in the
    kernel in all cases).
    """
    (w_ir, w_iz, w_in, w_hr, w_hz, w_hn,
     b_ir, b_iz, b_in, b_hr, b_hz, b_hn,
     w_fc, b_fc) = params
    I, H = w_ir.shape
    Hp = _round_up(H, LANE)
    Ip = _round_up(I, LANE)
    G = 3 * Hp
    mm_dtype = jnp.dtype(matmul_dtype)

    w_i = jnp.zeros((Ip, G), jnp.float32)
    w_i = w_i.at[:I, 0 * Hp:0 * Hp + H].set(w_ir)
    w_i = w_i.at[:I, 1 * Hp:1 * Hp + H].set(w_iz)
    w_i = w_i.at[:I, 2 * Hp:2 * Hp + H].set(w_in)

    w_h = jnp.zeros((Hp, G), jnp.float32)
    w_h = w_h.at[:H, 0 * Hp:0 * Hp + H].set(w_hr)
    w_h = w_h.at[:H, 1 * Hp:1 * Hp + H].set(w_hz)
    w_h = w_h.at[:H, 2 * Hp:2 * Hp + H].set(w_hn)

    # b_hr / b_hz fold into the input-side bias; b_hn must stay hidden-side
    # because of the r * (h W_hn + b_hn) gating.
    b_i = jnp.zeros((1, G), jnp.float32)
    b_i = b_i.at[:, 0 * Hp:0 * Hp + H].set(b_ir + b_hr)
    b_i = b_i.at[:, 1 * Hp:1 * Hp + H].set(b_iz + b_hz)
    b_i = b_i.at[:, 2 * Hp:2 * Hp + H].set(b_in)
    b_hn_p = jnp.zeros((1, Hp), jnp.float32).at[:, :H].set(b_hn)

    w_fc_p = jnp.zeros((Hp, LANE), jnp.float32).at[:H, :1].set(w_fc)
    b_fc_p = jnp.zeros((1, LANE), jnp.float32).at[:, :1].set(b_fc)

    # Matmul operands in mm_dtype; biases stay f32 (added post-matmul).
    return (w_i.astype(mm_dtype), w_h.astype(mm_dtype),
            b_i, b_hn_p, w_fc_p.astype(mm_dtype), b_fc_p)


@jax.jit
def gru_model_forward(x_bsi, packed):
    """x_bsi: (B, S, I) float32, packed: output of pack_params.  Returns (B, 1)."""
    B, S, I = x_bsi.shape
    w_i, w_h, b_i, b_hn, w_fc_p, b_fc_p = packed
    Ip = w_i.shape[0]
    Hp = w_h.shape[0]
    G = 3 * Hp
    mm_dtype = w_i.dtype

    # Time-major, lane-padded input (the only per-call prep left).
    x_p = jnp.zeros((S, B, Ip), mm_dtype)
    x_p = x_p.at[:, :, :I].set(jnp.transpose(x_bsi, (1, 0, 2)).astype(mm_dtype))

    def full_spec(shape):
        return pl.BlockSpec(shape, lambda *_: (0,) * len(shape))

    grid_spec = pltpu.PrefetchScalarGridSpec(
        num_scalar_prefetch=0,
        grid=(1,),                         # whole sequence in one grid point
        in_specs=[
            full_spec((S, B, Ip)),         # x (time-major, padded)
            full_spec((Ip, G)),            # W_i slab
            full_spec((Hp, G)),            # W_h slab
            full_spec((1, G)),             # b_i slab (b_hr/b_hz folded in)
            full_spec((1, Hp)),            # b_hn
            full_spec((Hp, LANE)),         # fc weight (padded)
            full_spec((1, LANE)),          # fc bias   (padded)
        ],
        out_specs=pl.BlockSpec((B, LANE), lambda *_: (0, 0)),
    )

    # TODO(synk): at much larger B on v7x, add a leading "parallel" grid axis
    # splitting B across the two TensorCores; at larger S*B, time-chunk Phase 1
    # (double-buffered VMEM scratch or emit_pipeline) and set vmem_limit_bytes
    # explicitly — pointless at these sizes.
    out_full = pl.pallas_call(
        gru_kernel,
        out_shape=jax.ShapeDtypeStruct((B, LANE), jnp.float32),
        grid_spec=grid_spec,
        compiler_params=pltpu.CompilerParams(
            dimension_semantics=("arbitrary",)),
    )(x_p, w_i, w_h, b_i, b_hn, w_fc_p, b_fc_p)

    return out_full[:, :1]


def init_params(key, input_size, hidden_size):
    """Deterministic init mimicking PyTorch U(-1/sqrt(H), 1/sqrt(H))."""
    H, I = hidden_size, input_size
    k = 1.0 / jnp.sqrt(jnp.float32(H))
    keys = jax.random.split(key, 14)
    u = lambda kk, shape: jax.random.uniform(kk, shape, jnp.float32, -k, k)
    # weights stored pre-transposed so the kernel does x @ W (= x @ W_pt^T)
    w_ir, w_iz, w_in = u(keys[0], (I, H)), u(keys[1], (I, H)), u(keys[2], (I, H))
    w_hr, w_hz, w_hn = u(keys[3], (H, H)), u(keys[4], (H, H)), u(keys[5], (H, H))
    b_ir, b_iz, b_in = u(keys[6], (1, H)), u(keys[7], (1, H)), u(keys[8], (1, H))
    b_hr, b_hz, b_hn = u(keys[9], (1, H)), u(keys[10], (1, H)), u(keys[11], (1, H))
    kf = 1.0 / jnp.sqrt(jnp.float32(H))
    w_fc = jax.random.uniform(keys[12], (H, 1), jnp.float32, -kf, kf)
    b_fc = jax.random.uniform(keys[13], (1, 1), jnp.float32, -kf, kf)
    return (w_ir, w_iz, w_in, w_hr, w_hz, w_hn,
            b_ir, b_iz, b_in, b_hr, b_hz, b_hn,
            w_fc, b_fc)


def reference_forward(x_bsi, params):
    """Pure-JAX reference matching PyTorch nn.GRU + nn.Linear."""
    (w_ir, w_iz, w_in, w_hr, w_hz, w_hn,
     b_ir, b_iz, b_in, b_hr, b_hz, b_hn,
     w_fc, b_fc) = params
    B, S, I = x_bsi.shape
    H = w_hr.shape[0]
    h = jnp.zeros((B, H), jnp.float32)
    for t in range(S):
        x_t = x_bsi[:, t, :]
        r = jax.nn.sigmoid(x_t @ w_ir + b_ir + h @ w_hr + b_hr)
        z = jax.nn.sigmoid(x_t @ w_iz + b_iz + h @ w_hz + b_hz)
        n = jnp.tanh(x_t @ w_in + b_in + r * (h @ w_hn + b_hn))
        h = (1.0 - z) * n + z * h
    return h @ w_fc + b_fc


if __name__ == "__main__":
    # TODO(synk): h_0 in the PyTorch module is zeros(1, B, H), so only
    # num_layers=1 is well-defined; this implements the single-layer GRU.
    batch, seq, input_size, hidden_size = 8, 8, 16, 32

    key = jax.random.PRNGKey(0)
    kx, kp = jax.random.split(key)
    x = jax.random.normal(kx, (batch, seq, input_size), jnp.float32)
    params = init_params(kp, input_size, hidden_size)

    ref = reference_forward(x, params)

    # Default path: bf16 matmul operands (recommended on ALL generations),
    # f32 accumulation + f32 gate math inside the kernel.
    packed_bf16 = pack_params(params)                       # pack ONCE
    out = gru_model_forward(x, packed_bf16)
    out = jax.block_until_ready(out)
    assert out.shape == (batch, 1)
    assert jnp.allclose(out, ref, rtol=3e-2, atol=3e-2), (out, ref)

    # f32 matmul path (strict numerical check of the kernel structure).
    packed_f32 = pack_params(params, matmul_dtype=jnp.float32)
    out_f32 = gru_model_forward(x, packed_f32)
    out_f32 = jax.block_until_ready(out_f32)
    assert out_f32.shape == (batch, 1)
    assert jnp.allclose(out_f32, ref, rtol=1e-4, atol=1e-4), (out_f32, ref)

    print("KERNEL_OK")
</pallas_src>

<mosaic_0001>
module attributes {stable_mosaic.version = 11 : i64} {
  func.func @gru_kernel(%arg0: i32, %arg1: memref<8x8x128xbf16, #tpu.memory_space<vmem>>, %arg2: memref<128x384xbf16, #tpu.memory_space<vmem>>, %arg3: memref<128x384xbf16, #tpu.memory_space<vmem>>, %arg4: memref<1x384xf32, #tpu.memory_space<vmem>>, %arg5: memref<1x128xf32, #tpu.memory_space<vmem>>, %arg6: memref<128x128xbf16, #tpu.memory_space<vmem>>, %arg7: memref<1x128xf32, #tpu.memory_space<vmem>>, %arg8: memref<8x128xf32, #tpu.memory_space<vmem>>) attributes {dimension_semantics = [#tpu.dimension_semantics<arbitrary>], iteration_bounds = array<i64: 1>, scalar_prefetch = 0 : i64, scratch_operands = 0 : i64, tpu.core_type = #tpu.core_type<tc>, window_params = [{pipeline_mode = #tpu.pipeline_mode<synchronous>, transform_indices = @transform_0, window_bounds = array<i64: 8, 8, 128>}, {pipeline_mode = #tpu.pipeline_mode<synchronous>, transform_indices = @transform_1, window_bounds = array<i64: 128, 384>}, {pipeline_mode = #tpu.pipeline_mode<synchronous>, transform_indices = @transform_2, window_bounds = array<i64: 128, 384>}, {pipeline_mode = #tpu.pipeline_mode<synchronous>, transform_indices = @transform_3, window_bounds = array<i64: 1, 384>}, {pipeline_mode = #tpu.pipeline_mode<synchronous>, transform_indices = @transform_4, window_bounds = array<i64: 1, 128>}, {pipeline_mode = #tpu.pipeline_mode<synchronous>, transform_indices = @transform_5, window_bounds = array<i64: 128, 128>}, {pipeline_mode = #tpu.pipeline_mode<synchronous>, transform_indices = @transform_6, window_bounds = array<i64: 1, 128>}, {pipeline_mode = #tpu.pipeline_mode<synchronous>, transform_indices = @transform_7, window_bounds = array<i64: 8, 128>}]} {
    %c0 = arith.constant 0 : index
    %c0_0 = arith.constant 0 : index
    %c0_1 = arith.constant 0 : index
    %0 = vector.load %arg1[%c0, %c0_0, %c0_1] : memref<8x8x128xbf16, #tpu.memory_space<vmem>>, vector<8x8x128xbf16>
    %1 = vector.shape_cast %0 : vector<8x8x128xbf16> to vector<64x128xbf16>
    %c0_2 = arith.constant 0 : index
    %c0_3 = arith.constant 0 : index
    %2 = vector.load %arg2[%c0_2, %c0_3] : memref<128x384xbf16, #tpu.memory_space<vmem>>, vector<128x384xbf16>
    %cst = arith.constant dense<0.000000e+00> : vector<64x384xf32>
    %3 = tpu.matmul %1, %2, %cst {dimension_numbers = #tpu.dot_dimension_numbers<[1], [0], [0], [1], [0, 0, 1, 1], [], []>} : vector<64x128xbf16>, vector<128x384xbf16>, vector<64x384xf32> -> vector<64x384xf32>
    %c0_4 = arith.constant 0 : index
    %c0_5 = arith.constant 0 : index
    %4 = vector.load %arg4[%c0_4, %c0_5] : memref<1x384xf32, #tpu.memory_space<vmem>>, vector<1x384xf32>
    %5 = vector.broadcast %4 : vector<1x384xf32> to vector<64x384xf32>
    %6 = arith.addf %3, %5 : vector<64x384xf32>
    %c0_6 = arith.constant 0 : index
    %c0_7 = arith.constant 0 : index
    %7 = vector.load %arg3[%c0_6, %c0_7] : memref<128x384xbf16, #tpu.memory_space<vmem>>, vector<128x384xbf16>
    %c0_8 = arith.constant 0 : index
    %c0_9 = arith.constant 0 : index
    %8 = vector.load %arg5[%c0_8, %c0_9] : memref<1x128xf32, #tpu.memory_space<vmem>>, vector<1x128xf32>
    %9 = vector.shape_cast %8 : vector<1x128xf32> to vector<1x128xf32>
    %10 = vector.broadcast %9 : vector<1x128xf32> to vector<8x128xf32>
    %cst_10 = arith.constant 0.000000e+00 : f32
    %11 = vector.broadcast %cst_10 : f32 to vector<8x128xf32>
    %12 = vector.extract_strided_slice %6 {offsets = [0, 0], sizes = [8, 384], strides = [1, 1]} : vector<64x384xf32> to vector<8x384xf32>
    %13 = arith.truncf %11 : vector<8x128xf32> to vector<8x128xbf16>
    %cst_11 = arith.constant dense<0.000000e+00> : vector<8x384xf32>
    %14 = tpu.matmul %13, %7, %cst_11 {dimension_numbers = #tpu.dot_dimension_numbers<[1], [0], [0], [1], [0, 0, 1, 1], [], []>} : vector<8x128xbf16>, vector<128x384xbf16>, vector<8x384xf32> -> vector<8x384xf32>
    %15 = vector.extract_strided_slice %12 {offsets = [0, 0], sizes = [8, 128], strides = [1, 1]} : vector<8x384xf32> to vector<8x128xf32>
    %16 = vector.extract_strided_slice %14 {offsets = [0, 0], sizes = [8, 128], strides = [1, 1]} : vector<8x384xf32> to vector<8x128xf32>
    %17 = arith.addf %15, %16 : vector<8x128xf32>
    %18 = arith.negf %17 : vector<8x128xf32>
    %19 = math.exp %18 : vector<8x128xf32>
    %cst_12 = arith.constant 1.000000e+00 : f32
    %20 = vector.broadcast %cst_12 : f32 to vector<8x128xf32>
    %21 = arith.addf %20, %19 : vector<8x128xf32>
    %22 = arith.divf %20, %21 : vector<8x128xf32>
    %23 = vector.extract_strided_slice %12 {offsets = [0, 128], sizes = [8, 128], strides = [1, 1]} : vector<8x384xf32> to vector<8x128xf32>
    %24 = vector.extract_strided_slice %14 {offsets = [0, 128], sizes = [8, 128], strides = [1, 1]} : vector<8x384xf32> to vector<8x128xf32>
    %25 = arith.addf %23, %24 : vector<8x128xf32>
    %26 = arith.negf %25 : vector<8x128xf32>
    %27 = math.exp %26 : vector<8x128xf32>
    %cst_13 = arith.constant 1.000000e+00 : f32
    %28 = vector.broadcast %cst_13 : f32 to vector<8x128xf32>
    %29 = arith.addf %28, %27 : vector<8x128xf32>
    %30 = arith.divf %28, %29 : vector<8x128xf32>
    %31 = vector.extract_strided_slice %12 {offsets = [0, 256], sizes = [8, 128], strides = [1, 1]} : vector<8x384xf32> to vector<8x128xf32>
    %32 = vector.extract_strided_slice %14 {offsets = [0, 256], sizes = [8, 128], strides = [1, 1]} : vector<8x384xf32> to vector<8x128xf32>
    %33 = arith.addf %32, %10 : vector<8x128xf32>
    %34 = arith.mulf %22, %33 : vector<8x128xf32>
    %35 = arith.addf %31, %34 : vector<8x128xf32>
    %36 = math.tanh %35 : vector<8x128xf32>
    %37 = arith.subf %11, %36 : vector<8x128xf32>
    %38 = arith.mulf %30, %37 : vector<8x128xf32>
    %39 = arith.addf %36, %38 : vector<8x128xf32>
    %40 = vector.extract_strided_slice %6 {offsets = [8, 0], sizes = [8, 384], strides = [1, 1]} : vector<64x384xf32> to vector<8x384xf32>
    %41 = arith.truncf %39 : vector<8x128xf32> to vector<8x128xbf16>
    %cst_14 = arith.constant dense<0.000000e+00> : vector<8x384xf32>
    %42 = tpu.matmul %41, %7, %cst_14 {dimension_numbers = #tpu.dot_dimension_numbers<[1], [0], [0], [1], [0, 0, 1, 1], [], []>} : vector<8x128xbf16>, vector<128x384xbf16>, vector<8x384xf32> -> vector<8x384xf32>
    %43 = vector.extract_strided_slice %40 {offsets = [0, 0], sizes = [8, 128], strides = [1, 1]} : vector<8x384xf32> to vector<8x128xf32>
    %44 = vector.extract_strided_slice %42 {offsets = [0, 0], sizes = [8, 128], strides = [1, 1]} : vector<8x384xf32> to vector<8x128xf32>
    %45 = arith.addf %43, %44 : vector<8x128xf32>
    %46 = arith.negf %45 : vector<8x128xf32>
    %47 = math.exp %46 : vector<8x128xf32>
    %cst_15 = arith.constant 1.000000e+00 : f32
    %48 = vector.broadcast %cst_15 : f32 to vector<8x128xf32>
    %49 = arith.addf %48, %47 : vector<8x128xf32>
    %50 = arith.divf %48, %49 : vector<8x128xf32>
    %51 = vector.extract_strided_slice %40 {offsets = [0, 128], sizes = [8, 128], strides = [1, 1]} : vector<8x384xf32> to vector<8x128xf32>
    %52 = vector.extract_strided_slice %42 {offsets = [0, 128], sizes = [8, 128], strides = [1, 1]} : vector<8x384xf32> to vector<8x128xf32>
    %53 = arith.addf %51, %52 : vector<8x128xf32>
    %54 = arith.negf %53 : vector<8x128xf32>
    %55 = math.exp %54 : vector<8x128xf32>
    %cst_16 = arith.constant 1.000000e+00 : f32
    %56 = vector.broadcast %cst_16 : f32 to vector<8x128xf32>
    %57 = arith.addf %56, %55 : vector<8x128xf32>
    %58 = arith.divf %56, %57 : vector<8x128xf32>
    %59 = vector.extract_strided_slice %40 {offsets = [0, 256], sizes = [8, 128], strides = [1, 1]} : vector<8x384xf32> to vector<8x128xf32>
    %60 = vector.extract_strided_slice %42 {offsets = [0, 256], sizes = [8, 128], strides = [1, 1]} : vector<8x384xf32> to vector<8x128xf32>
    %61 = arith.addf %60, %10 : vector<8x128xf32>
    %62 = arith.mulf %50, %61 : vector<8x128xf32>
    %63 = arith.addf %59, %62 : vector<8x128xf32>
    %64 = math.tanh %63 : vector<8x128xf32>
    %65 = arith.subf %39, %64 : vector<8x128xf32>
    %66 = arith.mulf %58, %65 : vector<8x128xf32>
    %67 = arith.addf %64, %66 : vector<8x128xf32>
    %68 = vector.extract_strided_slice %6 {offsets = [16, 0], sizes = [8, 384], strides = [1, 1]} : vector<64x384xf32> to vector<8x384xf32>
    %69 = arith.truncf %67 : vector<8x128xf32> to vector<8x128xbf16>
    %cst_17 = arith.constant dense<0.000000e+00> : vector<8x384xf32>
    %70 = tpu.matmul %69, %7, %cst_17 {dimension_numbers = #tpu.dot_dimension_numbers<[1], [0], [0], [1], [0, 0, 1, 1], [], []>} : vector<8x128xbf16>, vector<128x384xbf16>, vector<8x384xf32> -> vector<8x384xf32>
    %71 = vector.extract_strided_slice %68 {offsets = [0, 0], sizes = [8, 128], strides = [1, 1]} : vector<8x384xf32> to vector<8x128xf32>
    %72 = vector.extract_strided_slice %70 {offsets = [0, 0], sizes = [8, 128], strides = [1, 1]} : vector<8x384xf32> to vector<8x128xf32>
    %73 = arith.addf %71, %72 : vector<8x128xf32>
    %74 = arith.negf %73 : vector<8x128xf32>
    %75 = math.exp %74 : vector<8x128xf32>
    %cst_18 = arith.constant 1.000000e+00 : f32
    %76 = vector.broadcast %cst_18 : f32 to vector<8x128xf32>
    %77 = arith.addf %76, %75 : vector<8x128xf32>
    %78 = arith.divf %76, %77 : vector<8x128xf32>
    %79 = vector.extract_strided_slice %68 {offsets = [0, 128], sizes = [8, 128], strides = [1, 1]} : vector<8x384xf32> to vector<8x128xf32>
    %80 = vector.extract_strided_slice %70 {offsets = [0, 128], sizes = [8, 128], strides = [1, 1]} : vector<8x384xf32> to vector<8x128xf32>
    %81 = arith.addf %79, %80 : vector<8x128xf32>
    %82 = arith.negf %81 : vector<8x128xf32>
    %83 = math.exp %82 : vector<8x128xf32>
    %cst_19 = arith.constant 1.000000e+00 : f32
    %84 = vector.broadcast %cst_19 : f32 to vector<8x128xf32>
    %85 = arith.addf %84, %83 : vector<8x128xf32>
    %86 = arith.divf %84, %85 : vector<8x128xf32>
    %87 = vector.extract_strided_slice %68 {offsets = [0, 256], sizes = [8, 128], strides = [1, 1]} : vector<8x384xf32> to vector<8x128xf32>
    %88 = vector.extract_strided_slice %70 {offsets = [0, 256], sizes = [8, 128], strides = [1, 1]} : vector<8x384xf32> to vector<8x128xf32>
    %89 = arith.addf %88, %10 : vector<8x128xf32>
    %90 = arith.mulf %78, %89 : vector<8x128xf32>
    %91 = arith.addf %87, %90 : vector<8x128xf32>
    %92 = math.tanh %91 : vector<8x128xf32>
    %93 = arith.subf %67, %92 : vector<8x128xf32>
    %94 = arith.mulf %86, %93 : vector<8x128xf32>
    %95 = arith.addf %92, %94 : vector<8x128xf32>
    %96 = vector.extract_strided_slice %6 {offsets = [24, 0], sizes = [8, 384], strides = [1, 1]} : vector<64x384xf32> to vector<8x384xf32>
    %97 = arith.truncf %95 : vector<8x128xf32> to vector<8x128xbf16>
    %cst_20 = arith.constant dense<0.000000e+00> : vector<8x384xf32>
    %98 = tpu.matmul %97, %7, %cst_20 {dimension_numbers = #tpu.dot_dimension_numbers<[1], [0], [0], [1], [0, 0, 1, 1], [], []>} : vector<8x128xbf16>, vector<128x384xbf16>, vector<8x384xf32> -> vector<8x384xf32>
    %99 = vector.extract_strided_slice %96 {offsets = [0, 0], sizes = [8, 128], strides = [1, 1]} : vector<8x384xf32> to vector<8x128xf32>
    %100 = vector.extract_strided_slice %98 {offsets = [0, 0], sizes = [8, 128], strides = [1, 1]} : vector<8x384xf32> to vector<8x128xf32>
    %101 = arith.addf %99, %100 : vector<8x128xf32>
    %102 = arith.negf %101 : vector<8x128xf32>
    %103 = math.exp %102 : vector<8x128xf32>
    %cst_21 = arith.constant 1.000000e+00 : f32
    %104 = vector.broadcast %cst_21 : f32 to vector<8x128xf32>
    %105 = arith.addf %104, %103 : vector<8x128xf32>
    %106 = arith.divf %104, %105 : vector<8x128xf32>
    %107 = vector.extract_strided_slice %96 {offsets = [0, 128], sizes = [8, 128], strides = [1, 1]} : vector<8x384xf32> to vector<8x128xf32>
    %108 = vector.extract_strided_slice %98 {offsets = [0, 128], sizes = [8, 128], strides = [1, 1]} : vector<8x384xf32> to vector<8x128xf32>
    %109 = arith.addf %107, %108 : vector<8x128xf32>
    %110 = arith.negf %109 : vector<8x128xf32>
    %111 = math.exp %110 : vector<8x128xf32>
    %cst_22 = arith.constant 1.000000e+00 : f32
    %112 = vector.broadcast %cst_22 : f32 to vector<8x128xf32>
    %113 = arith.addf %112, %111 : vector<8x128xf32>
    %114 = arith.divf %112, %113 : vector<8x128xf32>
    %115 = vector.extract_strided_slice %96 {offsets = [0, 256], sizes = [8, 128], strides = [1, 1]} : vector<8x384xf32> to vector<8x128xf32>
    %116 = vector.extract_strided_slice %98 {offsets = [0, 256], sizes = [8, 128], strides = [1, 1]} : vector<8x384xf32> to vector<8x128xf32>
    %117 = arith.addf %116, %10 : vector<8x128xf32>
    %118 = arith.mulf %106, %117 : vector<8x128xf32>
    %119 = arith.addf %115, %118 : vector<8x128xf32>
    %120 = math.tanh %119 : vector<8x128xf32>
    %121 = arith.subf %95, %120 : vector<8x128xf32>
    %122 = arith.mulf %114, %121 : vector<8x128xf32>
    %123 = arith.addf %120, %122 : vector<8x128xf32>
    %124 = vector.extract_strided_slice %6 {offsets = [32, 0], sizes = [8, 384], strides = [1, 1]} : vector<64x384xf32> to vector<8x384xf32>
    %125 = arith.truncf %123 : vector<8x128xf32> to vector<8x128xbf16>
    %cst_23 = arith.constant dense<0.000000e+00> : vector<8x384xf32>
    %126 = tpu.matmul %125, %7, %cst_23 {dimension_numbers = #tpu.dot_dimension_numbers<[1], [0], [0], [1], [0, 0, 1, 1], [], []>} : vector<8x128xbf16>, vector<128x384xbf16>, vector<8x384xf32> -> vector<8x384xf32>
    %127 = vector.extract_strided_slice %124 {offsets = [0, 0], sizes = [8, 128], strides = [1, 1]} : vector<8x384xf32> to vector<8x128xf32>
    %128 = vector.extract_strided_slice %126 {offsets = [0, 0], sizes = [8, 128], strides = [1, 1]} : vector<8x384xf32> to vector<8x128xf32>
    %129 = arith.addf %127, %128 : vector<8x128xf32>
    %130 = arith.negf %129 : vector<8x128xf32>
    %131 = math.exp %130 : vector<8x128xf32>
    %cst_24 = arith.constant 1.000000e+00 : f32
    %132 = vector.broadcast %cst_24 : f32 to vector<8x128xf32>
    %133 = arith.addf %132, %131 : vector<8x128xf32>
    %134 = arith.divf %132, %133 : vector<8x128xf32>
    %135 = vector.extract_strided_slice %124 {offsets = [0, 128], sizes = [8, 128], strides = [1, 1]} : vector<8x384xf32> to vector<8x128xf32>
    %136 = vector.extract_strided_slice %126 {offsets = [0, 128], sizes = [8, 128], strides = [1, 1]} : vector<8x384xf32> to vector<8x128xf32>
    %137 = arith.addf %135, %136 : vector<8x128xf32>
    %138 = arith.negf %137 : vector<8x128xf32>
    %139 = math.exp %138 : vector<8x128xf32>
    %cst_25 = arith.constant 1.000000e+00 : f32
    %140 = vector.broadcast %cst_25 : f32 to vector<8x128xf32>
    %141 = arith.addf %140, %139 : vector<8x128xf32>
    %142 = arith.divf %140, %141 : vector<8x128xf32>
    %143 = vector.extract_strided_slice %124 {offsets = [0, 256], sizes = [8, 128], strides = [1, 1]} : vector<8x384xf32> to vector<8x128xf32>
    %144 = vector.extract_strided_slice %126 {offsets = [0, 256], sizes = [8, 128], strides = [1, 1]} : vector<8x384xf32> to vector<8x128xf32>
    %145 = arith.addf %144, %10 : vector<8x128xf32>
    %146 = arith.mulf %134, %145 : vector<8x128xf32>
    %147 = arith.addf %143, %146 : vector<8x128xf32>
    %148 = math.tanh %147 : vector<8x128xf32>
    %149 = arith.subf %123, %148 : vector<8x128xf32>
    %150 = arith.mulf %142, %149 : vector<8x128xf32>
    %151 = arith.addf %148, %150 : vector<8x128xf32>
    %152 = vector.extract_strided_slice %6 {offsets = [40, 0], sizes = [8, 384], strides = [1, 1]} : vector<64x384xf32> to vector<8x384xf32>
    %153 = arith.truncf %151 : vector<8x128xf32> to vector<8x128xbf16>
    %cst_26 = arith.constant dense<0.000000e+00> : vector<8x384xf32>
    %154 = tpu.matmul %153, %7, %cst_26 {dimension_numbers = #tpu.dot_dimension_numbers<[1], [0], [0], [1], [0, 0, 1, 1], [], []>} : vector<8x128xbf16>, vector<128x384xbf16>, vector<8x384xf32> -> vector<8x384xf32>
    %155 = vector.extract_strided_slice %152 {offsets = [0, 0], sizes = [8, 128], strides = [1, 1]} : vector<8x384xf32> to vector<8x128xf32>
    %156 = vector.extract_strided_slice %154 {offsets = [0, 0], sizes = [8, 128], strides = [1, 1]} : vector<8x384xf32> to vector<8x128xf32>
    %157 = arith.addf %155, %156 : vector<8x128xf32>
    %158 = arith.negf %157 : vector<8x128xf32>
    %159 = math.exp %158 : vector<8x128xf32>
    %cst_27 = arith.constant 1.000000e+00 : f32
    %160 = vector.broadcast %cst_27 : f32 to vector<8x128xf32>
    %161 = arith.addf %160, %159 : vector<8x128xf32>
    %162 = arith.divf %160, %161 : vector<8x128xf32>
    %163 = vector.extract_strided_slice %152 {offsets = [0, 128], sizes = [8, 128], strides = [1, 1]} : vector<8x384xf32> to vector<8x128xf32>
    %164 = vector.extract_strided_slice %154 {offsets = [0, 128], sizes = [8, 128], strides = [1, 1]} : vector<8x384xf32> to vector<8x128xf32>
    %165 = arith.addf %163, %164 : vector<8x128xf32>
    %166 = arith.negf %165 : vector<8x128xf32>
    %167 = math.exp %166 : vector<8x128xf32>
    %cst_28 = arith.constant 1.000000e+00 : f32
    %168 = vector.broadcast %cst_28 : f32 to vector<8x128xf32>
    %169 = arith.addf %168, %167 : vector<8x128xf32>
    %170 = arith.divf %168, %169 : vector<8x128xf32>
    %171 = vector.extract_strided_slice %152 {offsets = [0, 256], sizes = [8, 128], strides = [1, 1]} : vector<8x384xf32> to vector<8x128xf32>
    %172 = vector.extract_strided_slice %154 {offsets = [0, 256], sizes = [8, 128], strides = [1, 1]} : vector<8x384xf32> to vector<8x128xf32>
    %173 = arith.addf %172, %10 : vector<8x128xf32>
    %174 = arith.mulf %162, %173 : vector<8x128xf32>
    %175 = arith.addf %171, %174 : vector<8x128xf32>
    %176 = math.tanh %175 : vector<8x128xf32>
    %177 = arith.subf %151, %176 : vector<8x128xf32>
    %178 = arith.mulf %170, %177 : vector<8x128xf32>
    %179 = arith.addf %176, %178 : vector<8x128xf32>
    %180 = vector.extract_strided_slice %6 {offsets = [48, 0], sizes = [8, 384], strides = [1, 1]} : vector<64x384xf32> to vector<8x384xf32>
    %181 = arith.truncf %179 : vector<8x128xf32> to vector<8x128xbf16>
    %cst_29 = arith.constant dense<0.000000e+00> : vector<8x384xf32>
    %182 = tpu.matmul %181, %7, %cst_29 {dimension_numbers = #tpu.dot_dimension_numbers<[1], [0], [0], [1], [0, 0, 1, 1], [], []>} : vector<8x128xbf16>, vector<128x384xbf16>, vector<8x384xf32> -> vector<8x384xf32>
    %183 = vector.extract_strided_slice %180 {offsets = [0, 0], sizes = [8, 128], strides = [1, 1]} : vector<8x384xf32> to vector<8x128xf32>
    %184 = vector.extract_strided_slice %182 {offsets = [0, 0], sizes = [8, 128], strides = [1, 1]} : vector<8x384xf32> to vector<8x128xf32>
    %185 = arith.addf %183, %184 : vector<8x128xf32>
    %186 = arith.negf %185 : vector<8x128xf32>
    %187 = math.exp %186 : vector<8x128xf32>
    %cst_30 = arith.constant 1.000000e+00 : f32
    %188 = vector.broadcast %cst_30 : f32 to vector<8x128xf32>
    %189 = arith.addf %188, %187 : vector<8x128xf32>
    %190 = arith.divf %188, %189 : vector<8x128xf32>
    %191 = vector.extract_strided_slice %180 {offsets = [0, 128], sizes = [8, 128], strides = [1, 1]} : vector<8x384xf32> to vector<8x128xf32>
    %192 = vector.extract_strided_slice %182 {offsets = [0, 128], sizes = [8, 128], strides = [1, 1]} : vector<8x384xf32> to vector<8x128xf32>
    %193 = arith.addf %191, %192 : vector<8x128xf32>
    %194 = arith.negf %193 : vector<8x128xf32>
    %195 = math.exp %194 : vector<8x128xf32>
    %cst_31 = arith.constant 1.000000e+00 : f32
    %196 = vector.broadcast %cst_31 : f32 to vector<8x128xf32>
    %197 = arith.addf %196, %195 : vector<8x128xf32>
    %198 = arith.divf %196, %197 : vector<8x128xf32>
    %199 = vector.extract_strided_slice %180 {offsets = [0, 256], sizes = [8, 128], strides = [1, 1]} : vector<8x384xf32> to vector<8x128xf32>
    %200 = vector.extract_strided_slice %182 {offsets = [0, 256], sizes = [8, 128], strides = [1, 1]} : vector<8x384xf32> to vector<8x128xf32>
    %201 = arith.addf %200, %10 : vector<8x128xf32>
    %202 = arith.mulf %190, %201 : vector<8x128xf32>
    %203 = arith.addf %199, %202 : vector<8x128xf32>
    %204 = math.tanh %203 : vector<8x128xf32>
    %205 = arith.subf %179, %204 : vector<8x128xf32>
    %206 = arith.mulf %198, %205 : vector<8x128xf32>
    %207 = arith.addf %204, %206 : vector<8x128xf32>
    %208 = vector.extract_strided_slice %6 {offsets = [56, 0], sizes = [8, 384], strides = [1, 1]} : vector<64x384xf32> to vector<8x384xf32>
    %209 = arith.truncf %207 : vector<8x128xf32> to vector<8x128xbf16>
    %cst_32 = arith.constant dense<0.000000e+00> : vector<8x384xf32>
    %210 = tpu.matmul %209, %7, %cst_32 {dimension_numbers = #tpu.dot_dimension_numbers<[1], [0], [0], [1], [0, 0, 1, 1], [], []>} : vector<8x128xbf16>, vector<128x384xbf16>, vector<8x384xf32> -> vector<8x384xf32>
    %211 = vector.extract_strided_slice %208 {offsets = [0, 0], sizes = [8, 128], strides = [1, 1]} : vector<8x384xf32> to vector<8x128xf32>
    %212 = vector.extract_strided_slice %210 {offsets = [0, 0], sizes = [8, 128], strides = [1, 1]} : vector<8x384xf32> to vector<8x128xf32>
    %213 = arith.addf %211, %212 : vector<8x128xf32>
    %214 = arith.negf %213 : vector<8x128xf32>
    %215 = math.exp %214 : vector<8x128xf32>
    %cst_33 = arith.constant 1.000000e+00 : f32
    %216 = vector.broadcast %cst_33 : f32 to vector<8x128xf32>
    %217 = arith.addf %216, %215 : vector<8x128xf32>
    %218 = arith.divf %216, %217 : vector<8x128xf32>
    %219 = vector.extract_strided_slice %208 {offsets = [0, 128], sizes = [8, 128], strides = [1, 1]} : vector<8x384xf32> to vector<8x128xf32>
    %220 = vector.extract_strided_slice %210 {offsets = [0, 128], sizes = [8, 128], strides = [1, 1]} : vector<8x384xf32> to vector<8x128xf32>
    %221 = arith.addf %219, %220 : vector<8x128xf32>
    %222 = arith.negf %221 : vector<8x128xf32>
    %223 = math.exp %222 : vector<8x128xf32>
    %cst_34 = arith.constant 1.000000e+00 : f32
    %224 = vector.broadcast %cst_34 : f32 to vector<8x128xf32>
    %225 = arith.addf %224, %223 : vector<8x128xf32>
    %226 = arith.divf %224, %225 : vector<8x128xf32>
    %227 = vector.extract_strided_slice %208 {offsets = [0, 256], sizes = [8, 128], strides = [1, 1]} : vector<8x384xf32> to vector<8x128xf32>
    %228 = vector.extract_strided_slice %210 {offsets = [0, 256], sizes = [8, 128], strides = [1, 1]} : vector<8x384xf32> to vector<8x128xf32>
    %229 = arith.addf %228, %10 : vector<8x128xf32>
    %230 = arith.mulf %218, %229 : vector<8x128xf32>
    %231 = arith.addf %227, %230 : vector<8x128xf32>
    %232 = math.tanh %231 : vector<8x128xf32>
    %233 = arith.subf %207, %232 : vector<8x128xf32>
    %234 = arith.mulf %226, %233 : vector<8x128xf32>
    %235 = arith.addf %232, %234 : vector<8x128xf32>
    %236 = arith.truncf %235 : vector<8x128xf32> to vector<8x128xbf16>
    %c0_35 = arith.constant 0 : index
    %c0_36 = arith.constant 0 : index
    %237 = vector.load %arg6[%c0_35, %c0_36] : memref<128x128xbf16, #tpu.memory_space<vmem>>, vector<128x128xbf16>
    %cst_37 = arith.constant dense<0.000000e+00> : vector<8x128xf32>
    %238 = tpu.matmul %236, %237, %cst_37 {dimension_numbers = #tpu.dot_dimension_numbers<[1], [0], [0], [1], [0, 0, 1, 1], [], []>} : vector<8x128xbf16>, vector<128x128xbf16>, vector<8x128xf32> -> vector<8x128xf32>
    %c0_38 = arith.constant 0 : index
    %c0_39 = arith.constant 0 : index
    %239 = vector.load %arg7[%c0_38, %c0_39] : memref<1x128xf32, #tpu.memory_space<vmem>>, vector<1x128xf32>
    %240 = vector.broadcast %239 : vector<1x128xf32> to vector<8x128xf32>
    %241 = arith.addf %238, %240 : vector<8x128xf32>
    %c0_40 = arith.constant 0 : index
    %c0_41 = arith.constant 0 : index
    %242 = vector.load %arg8[%c0_40, %c0_41] : memref<8x128xf32, #tpu.memory_space<vmem>>, vector<8x128xf32>
    tpu.vector_store %arg8[%c0_40, %c0_41], %241 {strides = array<i32>} : memref<8x128xf32, #tpu.memory_space<vmem>>, vector<8x128xf32>,
    return
  }
  func.func @transform_0(%arg0: i32) -> (i32, i32, i32) {
    %c0_i32 = arith.constant 0 : i32
    %c0_i32_0 = arith.constant 0 : i32
    %c0_i32_1 = arith.constant 0 : i32
    %c0_i32_2 = arith.constant 0 : i32
    return %c0_i32, %c0_i32_0, %c0_i32_1 : i32, i32, i32
  }
  func.func @transform_1(%arg0: i32) -> (i32, i32) {
    %c0_i32 = arith.constant 0 : i32
    %c0_i32_0 = arith.constant 0 : i32
    %c0_i32_1 = arith.constant 0 : i32
    return %c0_i32, %c0_i32_0 : i32, i32
  }
  func.func @transform_2(%arg0: i32) -> (i32, i32) {
    %c0_i32 = arith.constant 0 : i32
    %c0_i32_0 = arith.constant 0 : i32
    %c0_i32_1 = arith.constant 0 : i32
    return %c0_i32, %c0_i32_0 : i32, i32
  }
  func.func @transform_3(%arg0: i32) -> (i32, i32) {
    %c0_i32 = arith.constant 0 : i32
    %c0_i32_0 = arith.constant 0 : i32
    %c0_i32_1 = arith.constant 0 : i32
    return %c0_i32, %c0_i32_0 : i32, i32
  }
  func.func @transform_4(%arg0: i32) -> (i32, i32) {
    %c0_i32 = arith.constant 0 : i32
    %c0_i32_0 = arith.constant 0 : i32
    %c0_i32_1 = arith.constant 0 : i32
    return %c0_i32, %c0_i32_0 : i32, i32
  }
  func.func @transform_5(%arg0: i32) -> (i32, i32) {
    %c0_i32 = arith.constant 0 : i32
    %c0_i32_0 = arith.constant 0 : i32
    %c0_i32_1 = arith.constant 0 : i32
    return %c0_i32, %c0_i32_0 : i32, i32
  }
  func.func @transform_6(%arg0: i32) -> (i32, i32) {
    %c0_i32 = arith.constant 0 : i32
    %c0_i32_0 = arith.constant 0 : i32
    %c0_i32_1 = arith.constant 0 : i32
    return %c0_i32, %c0_i32_0 : i32, i32
  }
  func.func @transform_7(%arg0: i32) -> (i32, i32) {
    %c0_i32 = arith.constant 0 : i32
    %c0_i32_0 = arith.constant 0 : i32
    %c0_i32_1 = arith.constant 0 : i32
    return %c0_i32, %c0_i32_0 : i32, i32
  }
}

</mosaic_0001>

<bundles_post_ra>
// kernel: gru_model_forward.1
= control target key start
LH: loop header
LB: loop body
LE: loop exit
PB: predicated region body
PF: predicated region fallthrough
CT: control target
= control target key end

     0   :  { %12 = vsyncpa [#allocation3], 0  ;;  %s2216_s0 = inlined_call_operand.vmem [shape: bf16[8,8,128], index: 0, kind: input, shape index: {}]   ;;  %s2217_s1 = inlined_call_operand.hbm [shape: bf16[128,384], index: 1, kind: input, shape index: {}]   ;;  %s2218_s2 = inlined_call_operand.hbm [shape: bf16[128,384], index: 2, kind: input, shape index: {}]   ;;  %s2219_s3 = inlined_call_operand.vmem [shape: f32[1,384], index: 3, kind: input, shape index: {}]   ;;  %s2220_s4 = inlined_call_operand.vmem [shape: f32[1,128], index: 4, kind: input, shape index: {}]   ;;  %s2221_s5 = inlined_call_operand.vmem [shape: bf16[128,128], index: 5, kind: input, shape index: {}]   ;;  %s2222_s6 = inlined_call_operand.vmem [shape: f32[1,128], index: 6, kind: input, shape index: {}]   ;;  %s2223_s7 = inlined_call_operand.vmem [shape: f32[8,128], index: 7, kind: output, shape index: {}]  }
   0x1   :  { %s20_s26 = sshll.u32 %s2217_s1, 4  ;;  %s21_s26 = int_to_ptr.hbm [resolvable:$true] %s20_s26 }
   0x2   :  { %13 = vsyncpa [#allocation5], 0  ;;  %s1750_s27 = smov [#allocation2]   ;;  %s33_s8 = sshll.u32 %s2218_s2, 4  ;;  %s34_s8 = int_to_ptr.hbm [resolvable:$true] %s33_s8 }
   0x3   :  { %s22_s28 = sshll.u32 %s1750_s27, 4  ;;  %s1751_s9 = smov 192   ;;  %s23_s28 = int_to_ptr.vmem [resolvable:$true] %s22_s28 }
   0x4   :  { %s1752_s10 = smov 12   ;;  %s1753_s11 = smov [#allocation4]  }
   0x5   :  { %28 = dma.hbm_to_vmem [thread:$0]  %s21_s26, 3072, %s23_s28, [#allocation3], %s1751_s9, %s1751_s9, %s1752_s10  }
   0x6   :  { %s35_s12 = sshll.u32 %s1753_s11, 4  ;;  %s36_s12 = int_to_ptr.vmem [resolvable:$true] %s35_s12 }
   0x7   :  { %41 = dma.hbm_to_vmem [thread:$0]  %s34_s8, 3072, %s36_s12, [#allocation5], %s1751_s9, %s1751_s9, %s1752_s10  }
   0x8   :  { %1746 = dma.done.wait [#allocation3], 3072  }
   0x9   :  { %1747 = vsyncadd [#allocation3], 4294964224 }
   0xa   :  { %1748 = dma.done.wait [#allocation5], 3072  }
   0xb   :  { %1749 = vsyncadd [#allocation5], 4294964224  ;;  %v1396_v0 = vld [vmem:[#allocation2 + $0xa8] sm:$0xf]  ;;  %v1576_v1 = vld [vmem:[#allocation2 + $0xb0] sm:$0xf0] }
   0xc   :  { %v1492_v2 = vld [vmem:[#allocation4 + $0xa8] sm:$0xf]  ;;  %v1397_v3 = vor.u32 %v1576_v1, %v1396_v0  ;;  %v1600_v4 = vld [vmem:[#allocation4 + $0xb0] sm:$0xf0]  ;;  %v1384_v5 = vld [vmem:[#allocation2 + $0x90] sm:$0xf] }
   0xd   :  { %v1573_v6 = vld [vmem:[#allocation2 + $0x98] sm:$0xf0]  ;;  %v1801_v7 = vor.u32 %v1600_v4, %v1492_v2  ;;  %v1480_v8 = vld [vmem:[#allocation4 + $0x90] sm:$0xf]  ;;  %v1372_v12 = vld [vmem:[#allocation2 + $0x78] sm:$0xf] }
   0xe   :  { %v1597_v9 = vld [vmem:[#allocation4 + $0x98] sm:$0xf0]  ;;  %259 = vmatpush.bf16.msra.mxu0 %v1397_v3  ;;  %v1385_v10 = vor.u32 %v1573_v6, %v1384_v5  ;;  %v1570_v13 = vld [vmem:[#allocation2 + $0x80] sm:$0xf0]  ;;  %v1468_v14 = vld [vmem:[#allocation4 + $0x78] sm:$0xf] }
   0xf   :  { %510 = vmatpush.bf16.msra.mxu3 %v1801_v7  ;;  %v1804_v11 = vor.u32 %v1597_v9, %v1480_v8  ;;  %v1594_v15 = vld [vmem:[#allocation4 + $0x80] sm:$0xf0]  ;;  %v1373_v16 = vor.u32 %v1570_v13, %v1372_v12  ;;  %v1360_v18 = vld [vmem:[#allocation2 + $0x60] sm:$0xf]  ;;  %v1567_v19 = vld [vmem:[#allocation2 + $0x68] sm:$0xf0] }
  0x10   :  { %v1807_v17 = vor.u32 %v1594_v15, %v1468_v14  ;;  %v1456_v20 = vld [vmem:[#allocation4 + $0x60] sm:$0xf]  ;;  %v1591_v21 = vld [vmem:[#allocation4 + $0x68] sm:$0xf0]  ;;  %v1361_v22 = vor.u32 %v1567_v19, %v1360_v18  ;;  %v1348_v23 = vld [vmem:[#allocation2 + $0x48] sm:$0xf] }
  0x11   :  { %v1810_v24 = vor.u32 %v1591_v21, %v1456_v20  ;;  %v1564_v25 = vld [vmem:[#allocation2 + $0x50] sm:$0xf0]  ;;  %v1575_v26 = vld [vmem:[#allocation2 + $0xac] sm:$0xf]  ;;  %v1398_v27 = vld [vmem:[#allocation2 + $0xb4] sm:$0xf0] }
  0x12   :  { %260 = vmatpush.bf16.msra.mxu0 %v1385_v10  ;;  %v1444_v28 = vld [vmem:[#allocation4 + $0x48] sm:$0xf]  ;;  %v1588_v29 = vld [vmem:[#allocation4 + $0x50] sm:$0xf0]  ;;  %v1401_v30 = vor.u32 %v1575_v26, %v1398_v27  ;;  %v1386_v32 = vld [vmem:[#allocation2 + $0x9c] sm:$0xf0]  ;;  %v1349_v33 = vor.u32 %v1564_v25, %v1348_v23 }
  0x13   :  { %511 = vmatpush.bf16.msra.mxu3 %v1804_v11  ;;  %v1572_v31 = vld [vmem:[#allocation2 + $0x94] sm:$0xf]  ;;  %v1336_v34 = vld [vmem:[#allocation2 + $0x30] sm:$0xf]  ;;  %v1813_v36 = vor.u32 %v1588_v29, %v1444_v28  ;;  %v1561_v37 = vld [vmem:[#allocation2 + $0x38] sm:$0xf0] }
  0x14   :  { %288 = vmatpush.bf16.msra.mxu1 %v1401_v30  ;;  %v1389_v35 = vor.u32 %v1572_v31, %v1386_v32  ;;  %v1569_v38 = vld [vmem:[#allocation2 + $0x7c] sm:$0xf]  ;;  %v1374_v39 = vld [vmem:[#allocation2 + $0x84] sm:$0xf0]  ;;  %v1432_v40 = vld [vmem:[#allocation4 + $0x30] sm:$0xf]  ;;  %v1337_v42 = vor.u32 %v1561_v37, %v1336_v34 }
  0x15   :  { %v1585_v41 = vld [vmem:[#allocation4 + $0x38] sm:$0xf0]  ;;  %v1324_v43 = vld [vmem:[#allocation2 + $0x18] sm:$0xf]  ;;  %v1558_v44 = vld [vmem:[#allocation2 + $0x20] sm:$0xf0]  ;;  %v1377_v46 = vor.u32 %v1569_v38, %v1374_v39 }
  0x16   :  { %261 = vmatpush.bf16.msra.mxu0 %v1373_v16  ;;  %v1420_v45 = vld [vmem:[#allocation4 + $0x18] sm:$0xf]  ;;  %v1816_v47 = vor.u32 %v1585_v41, %v1432_v40  ;;  %v1566_v48 = vld [vmem:[#allocation2 + $0x64] sm:$0xf]  ;;  %v1362_v49 = vld [vmem:[#allocation2 + $0x6c] sm:$0xf0]  ;;  %v1325_v55 = vor.u32 %v1558_v44, %v1324_v43 }
  0x17   :  { %512 = vmatpush.bf16.msra.mxu3 %v1807_v17  ;;  %v1582_v50 = vld [vmem:[#allocation4 + $0x20] sm:$0xf0]  ;;  %v1404_v51 = vld [vmem:[#allocation2 + $0xb0] sm:$0xf]  ;;  %v1577_v52 = vld [vmem:[#allocation2 + $0xb8] sm:$0xf0]  ;;  %v1365_v58 = vor.u32 %v1566_v48, %v1362_v49 }
  0x18   :  { %289 = vmatpush.bf16.msra.mxu1 %v1389_v35  ;;  %v1312_v53 = vld [vmem:[#allocation2] sm:$0xf]  ;;  %v1405_v54 = vor.u32 %v1577_v52, %v1404_v51  ;;  %v1555_v56 = vld [vmem:[#allocation2 + $0x8] sm:$0xf0]  ;;  %v1819_v59 = vor.u32 %v1582_v50, %v1420_v45  ;;  %v1350_v62 = vld [vmem:[#allocation2 + $0x54] sm:$0xf0] }
  0x19   :  { %v1408_v57 = vld [vmem:[#allocation4] sm:$0xf]  ;;  %v1579_v60 = vld [vmem:[#allocation4 + $0x8] sm:$0xf0]  ;;  %v1500_v63 = vld [vmem:[#allocation4 + $0xb0] sm:$0xf]  ;;  %v1313_v5 = vor.u32 %v1555_v56, %v1312_v53 }
  0x1a   :  { %262 = vmatpush.bf16.msra.mxu0 %v1361_v22  ;;  %v1563_v61 = vld [vmem:[#allocation2 + $0x4c] sm:$0xf]  ;;  %317 = vmatpush.bf16.msra.mxu2 %v1405_v54  ;;  %v1601_v0 = vld [vmem:[#allocation4 + $0xb8] sm:$0xf0]  ;;  %v1392_v1 = vld [vmem:[#allocation2 + $0x98] sm:$0xf]  ;;  %v1822_v9 = vor.u32 %v1579_v60, %v1408_v57 }
  0x1b   :  { %513 = vmatpush.bf16.msra.mxu3 %v1810_v24  ;;  %v1599_v2 = vld [vmem:[#allocation4 + $0xac] sm:$0xf]  ;;  %v1494_v3 = vld [vmem:[#allocation4 + $0xb4] sm:$0xf0]  ;;  %v1574_v4 = vld [vmem:[#allocation2 + $0xa0] sm:$0xf0]  ;;  %v1353_v6 = vor.u32 %v1563_v61, %v1350_v62  ;;  %v1824_v10 = vor.u32 %v1601_v0, %v1500_v63 }
  0x1c   :  { %290 = vmatpush.bf16.msra.mxu1 %v1377_v46  ;;  %v1393_v8 = vor.u32 %v1574_v4, %v1392_v1  ;;  %v1488_v12 = vld [vmem:[#allocation4 + $0x98] sm:$0xf]  ;;  %v1560_v13 = vld [vmem:[#allocation2 + $0x34] sm:$0xf]  ;;  %v1338_v14 = vld [vmem:[#allocation2 + $0x3c] sm:$0xf0]  ;;  %v1826_v15 = vor.u32 %v1599_v2, %v1494_v3 }
  0x1d   :  { %v1598_v16 = vld [vmem:[#allocation4 + $0xa0] sm:$0xf0]  ;;  %v1380_v18 = vld [vmem:[#allocation2 + $0x80] sm:$0xf]  ;;  %v1571_v19 = vld [vmem:[#allocation2 + $0x88] sm:$0xf0]  ;;  %v1341_v25 = vor.u32 %v1560_v13, %v1338_v14 }
  0x1e   :  { %263 = vmatpush.bf16.msra.mxu0 %v1349_v33  ;;  %318 = vmatpush.bf16.msra.mxu2 %v1393_v8  ;;  %v1831_v20 = vld [vmem:[%s2216_s0] sm:$0xff]  ;;  %v1596_v21 = vld [vmem:[#allocation4 + $0x94] sm:$0xf]  ;;  %v1381_v23 = vor.u32 %v1571_v19, %v1380_v18  ;;  %v1835_v26 = vor.u32 %v1598_v16, %v1488_v12  ;;  %v1557_v28 = vld [vmem:[#allocation2 + $0x1c] sm:$0xf]  ;;  %v1754_v39 = vmov 0  }
  0x1f   :  { %514 = vmatpush.bf16.msra.mxu3 %v1813_v36  ;;  %v1482_v22 = vld [vmem:[#allocation4 + $0x9c] sm:$0xf0]  ;;  %v1326_v29 = vld [vmem:[#allocation2 + $0x24] sm:$0xf0]  ;;  %v1595_v31 = vld [vmem:[#allocation4 + $0x88] sm:$0xf0] }
  0x20   :  { %291 = vmatpush.bf16.msra.mxu1 %v1365_v58  ;;  %v1476_v27 = vld [vmem:[#allocation4 + $0x80] sm:$0xf]  ;;  %v1838_v30 = vor.u32 %v1596_v21, %v1482_v22  ;;  %v1368_v32 = vld [vmem:[#allocation2 + $0x68] sm:$0xf]  ;;  %v1568_v33 = vld [vmem:[#allocation2 + $0x70] sm:$0xf0]  ;;  %v1329_v40 = vor.u32 %v1557_v28, %v1326_v29 }
  0x21   :  { %v1593_v34 = vld [vmem:[#allocation4 + $0x7c] sm:$0xf]  ;;  %v1470_v35 = vld [vmem:[#allocation4 + $0x84] sm:$0xf0]  ;;  %v1369_v37 = vor.u32 %v1568_v33, %v1368_v32  ;;  %v1356_v38 = vld [vmem:[#allocation2 + $0x50] sm:$0xf] }
  0x22   :  { %264 = vmatpush.bf16.msra.mxu0 %v1337_v42  ;;  %319 = vmatpush.bf16.msra.mxu2 %v1381_v23  ;;  %v1565_v41 = vld [vmem:[#allocation2 + $0x58] sm:$0xf0]  ;;  %v1843_v42 = vor.u32 %v1595_v31, %v1476_v27  ;;  %v1554_v43 = vld [vmem:[#allocation2 + $0x4] sm:$0xf]  ;;  %v1314_v44 = vld [vmem:[#allocation2 + $0xc] sm:$0xf0]  ;;  %v1846_v45 = vor.u32 %v1593_v34, %v1470_v35 }
  0x23   :  { %515 = vmatpush.bf16.msra.mxu3 %v1816_v47  ;;  %v1590_v46 = vld [vmem:[#allocation4 + $0x64] sm:$0xf]  ;;  %v1464_v48 = vld [vmem:[#allocation4 + $0x68] sm:$0xf]  ;;  %v1592_v49 = vld [vmem:[#allocation4 + $0x70] sm:$0xf0]  ;;  %v1357_v50 = vor.u32 %v1565_v41, %v1356_v38  ;;  %v1317_v54 = vor.u32 %v1554_v43, %v1314_v44 }
  0x24   :  { %292 = vmatpush.bf16.msra.mxu1 %v1353_v6  ;;  %v1458_v51 = vld [vmem:[#allocation4 + $0x6c] sm:$0xf0]  ;;  %v1344_v52 = vld [vmem:[#allocation2 + $0x38] sm:$0xf]  ;;  %v1562_v53 = vld [vmem:[#allocation2 + $0x40] sm:$0xf0] }
  0x25   :  { %v1852_v56 = vor.u32 %v1590_v46, %v1458_v51  ;;  %v1587_v57 = vld [vmem:[#allocation4 + $0x4c] sm:$0xf]  ;;  %v1452_v58 = vld [vmem:[#allocation4 + $0x50] sm:$0xf]  ;;  %v1589_v60 = vld [vmem:[#allocation4 + $0x58] sm:$0xf0]  ;;  %v1345_v61 = vor.u32 %v1562_v53, %v1344_v52 }
  0x26   :  { %265 = vmatpush.bf16.msra.mxu0 %v1325_v55  ;;  %320 = vmatpush.bf16.msra.mxu2 %v1369_v37  ;;  %v1849_v55 = vor.u32 %v1592_v49, %v1464_v48  ;;  %v1446_v62 = vld [vmem:[#allocation4 + $0x54] sm:$0xf0]  ;;  %v1332_v63 = vld [vmem:[#allocation2 + $0x20] sm:$0xf]  ;;  %v1559_v0 = vld [vmem:[#allocation2 + $0x28] sm:$0xf0]  ;;  %v1855_v1 = vor.u32 %v1589_v60, %v1452_v58 }
  0x27   :  { %516 = vmatpush.bf16.msra.mxu3 %v1819_v59  ;;  %v1859_v2 = vor.u32 %v1587_v57, %v1446_v62  ;;  %v1440_v3 = vld [vmem:[#allocation4 + $0x38] sm:$0xf]  ;;  %v1586_v4 = vld [vmem:[#allocation4 + $0x40] sm:$0xf0]  ;;  %v1551_v6 = vld [vmem:[%s2216_s0 + $0x8] sm:$0xff] }
  0x28   :  { %293 = vmatpush.bf16.msra.mxu1 %v1341_v25  ;;  %v1584_v8 = vld [vmem:[#allocation4 + $0x34] sm:$0xf]  ;;  %v1434_v12 = vld [vmem:[#allocation4 + $0x3c] sm:$0xf0]  ;;  %v1866_v13 = vor.u32 %v1586_v4, %v1440_v3  ;;  %v1581_v16 = vld [vmem:[#allocation4 + $0x1c] sm:$0xf] }
  0x29   :  { %v1870_v14 = vor.u32 %v1584_v8, %v1434_v12  ;;  %v1320_v18 = vld [vmem:[#allocation2 + $0x8] sm:$0xf]  ;;  %v1556_v19 = vld [vmem:[#allocation2 + $0x10] sm:$0xf0]  ;;  %v1428_v22 = vld [vmem:[#allocation4 + $0x20] sm:$0xf] }
  0x2a   :  { %266 = vmatpush.bf16.msra.mxu0 %v1313_v5  ;;  %321 = vmatpush.bf16.msra.mxu2 %v1357_v50  ;;  %v1333_v5 = vor.u32 %v1559_v0, %v1332_v63  ;;  %v1422_v21 = vld [vmem:[#allocation4 + $0x24] sm:$0xf0]  ;;  %v1583_v23 = vld [vmem:[#allocation4 + $0x28] sm:$0xf0]  ;;  %v1321_v25 = vor.u32 %v1556_v19, %v1320_v18  ;;  %v1580_v31 = vld [vmem:[#allocation4 + $0x10] sm:$0xf0] }
  0x2b   :  { %517 = vmatpush.bf16.msra.mxu3 %v1822_v9  ;;  %v1873_v27 = vor.u32 %v1583_v23, %v1428_v22  ;;  %v1877_v28 = vor.u32 %v1581_v16, %v1422_v21  ;;  %v1416_v29 = vld [vmem:[#allocation4 + $0x8] sm:$0xf]  ;;  %v1578_v32 = vld [vmem:[#allocation4 + $0x4] sm:$0xf]  ;;  %v1410_v33 = vld [vmem:[#allocation4 + $0xc] sm:$0xf0] }
  0x2c   :  { %294 = vmatpush.bf16.msra.mxu1 %v1329_v40  ;;  %v1882_v34 = vor.u32 %v1580_v31, %v1416_v29  ;;  %v1885_v35 = vor.u32 %v1578_v32, %v1410_v33  ;;  %v1553_v37 = vld [vmem:[%s2216_s0 + $0x18] sm:$0xff] }
  0x2d   :  { %267 = vmatmul.bf16.vlgmr.msra.gmra.mxu0 %v1831_v20 }
  0x2e   :  { %536 = vmatpush.bf16.msrb.mxu0 %v1824_v10  ;;  %518 = vmatmul.bf16.vlgmr.msra.gmra.mxu3 %v1754_v39 }
  0x2f   :  { %523 = vmatpush.bf16.msrb.mxu3 %v1826_v15  ;;  %322 = vmatpush.bf16.msra.mxu2 %v1345_v61 }
  0x30   :  { %295 = vmatpush.bf16.msra.mxu1 %v1317_v54 }
  0x32   :  { %537 = vmatpush.bf16.msrb.mxu0 %v1835_v26 }
  0x33   :  { %524 = vmatpush.bf16.msrb.mxu3 %v1838_v30  ;;  %296 = vmatmul.bf16.vlgmr.msra.gmra.mxu1 %v1831_v20 }
  0x34   :  { %597 = vmatpush.bf16.msrb.mxu1 %v1801_v7  ;;  %323 = vmatpush.bf16.msra.mxu2 %v1333_v5 }
  0x36   :  { %538 = vmatpush.bf16.msrb.mxu0 %v1843_v42 }
  0x37   :  { %525 = vmatpush.bf16.msrb.mxu3 %v1846_v45 }
  0x38   :  { %598 = vmatpush.bf16.msrb.mxu1 %v1804_v11  ;;  %324 = vmatpush.bf16.msra.mxu2 %v1321_v25 }
  0x3a   :  { %539 = vmatpush.bf16.msrb.mxu0 %v1849_v55 }
  0x3b   :  { %526 = vmatpush.bf16.msrb.mxu3 %v1852_v56  ;;  %325 = vmatmul.bf16.vlgmr.msra.gmra.mxu2 %v1831_v20  ;;  %v1552_v20 = vld [vmem:[%s2216_s0 + $0x10] sm:$0xff] }
  0x3c   :  { %599 = vmatpush.bf16.msrb.mxu1 %v1807_v17  ;;  %610 = vmatpush.bf16.msrb.mxu2 %v1826_v15 }
  0x3d   :  { %272 = vmatmul.bf16.gmra.mxu0 %v1551_v6 }
  0x3e   :  { %540 = vmatpush.bf16.msrb.mxu0 %v1855_v1 }
  0x3f   :  { %527 = vmatpush.bf16.msrb.mxu3 %v1859_v2 }
  0x40   :  { %600 = vmatpush.bf16.msrb.mxu1 %v1810_v24  ;;  %611 = vmatpush.bf16.msrb.mxu2 %v1838_v30 }
  0x42   :  { %541 = vmatpush.bf16.msrb.mxu0 %v1866_v13 }
  0x43   :  { %528 = vmatpush.bf16.msrb.mxu3 %v1870_v14  ;;  %301 = vmatmul.bf16.gmra.mxu1 %v1551_v6 }
  0x44   :  { %601 = vmatpush.bf16.msrb.mxu1 %v1813_v36  ;;  %612 = vmatpush.bf16.msrb.mxu2 %v1846_v45 }
  0x46   :  { %542 = vmatpush.bf16.msrb.mxu0 %v1873_v27 }
  0x47   :  { %529 = vmatpush.bf16.msrb.mxu3 %v1877_v28 }
  0x48   :  { %602 = vmatpush.bf16.msrb.mxu1 %v1816_v47  ;;  %613 = vmatpush.bf16.msrb.mxu2 %v1852_v56 }
  0x4a   :  { %543 = vmatpush.bf16.msrb.mxu0 %v1882_v34 }
  0x4b   :  { %530 = vmatpush.bf16.msrb.mxu3 %v1885_v35  ;;  %330 = vmatmul.bf16.gmra.mxu2 %v1551_v6 }
  0x4c   :  { %603 = vmatpush.bf16.msrb.mxu1 %v1819_v59  ;;  %614 = vmatpush.bf16.msrb.mxu2 %v1859_v2 }
  0x4d   :  { %277 = vmatmul.bf16.gmra.mxu0 %v1552_v20 }
  0x4e   :  { %684 = vmatpush.bf16.msra.mxu0 %v1801_v7  ;;  %531 = vmatmul.bf16.vlgmr.msrb.gmra.mxu3 %v1754_v39 }
  0x4f   :  { %623 = vmatpush.bf16.msra.mxu3 %v1824_v10 }
  0x50   :  { %604 = vmatpush.bf16.msrb.mxu1 %v1822_v9  ;;  %615 = vmatpush.bf16.msrb.mxu2 %v1870_v14 }
  0x52   :  { %685 = vmatpush.bf16.msra.mxu0 %v1804_v11 }
  0x53   :  { %624 = vmatpush.bf16.msra.mxu3 %v1835_v26  ;;  %306 = vmatmul.bf16.gmra.mxu1 %v1552_v20 }
  0x54   :  { %697 = vmatpush.bf16.msra.mxu1 %v1826_v15  ;;  %616 = vmatpush.bf16.msrb.mxu2 %v1877_v28 }
  0x56   :  { %686 = vmatpush.bf16.msra.mxu0 %v1807_v17 }
  0x57   :  { %625 = vmatpush.bf16.msra.mxu3 %v1843_v42 }
  0x58   :  { %698 = vmatpush.bf16.msra.mxu1 %v1838_v30  ;;  %617 = vmatpush.bf16.msrb.mxu2 %v1885_v35 }
  0x5a   :  { %687 = vmatpush.bf16.msra.mxu0 %v1810_v24 }
  0x5b   :  { %626 = vmatpush.bf16.msra.mxu3 %v1849_v55  ;;  %335 = vmatmul.bf16.gmra.mxu2 %v1552_v20 }
  0x5c   :  { %710 = vmatpush.bf16.msra.mxu2 %v1824_v10  ;;  %699 = vmatpush.bf16.msra.mxu1 %v1846_v45 }
  0x5d   :  { %282 = vmatmul.bf16.gmra.mxu0 %v1553_v37 }
  0x5e   :  { %688 = vmatpush.bf16.msra.mxu0 %v1813_v36 }
  0x5f   :  { %627 = vmatpush.bf16.msra.mxu3 %v1855_v1 }
  0x60   :  { %711 = vmatpush.bf16.msra.mxu2 %v1835_v26  ;;  %700 = vmatpush.bf16.msra.mxu1 %v1852_v56 }
  0x62   :  { %689 = vmatpush.bf16.msra.mxu0 %v1816_v47 }
  0x63   :  { %628 = vmatpush.bf16.msra.mxu3 %v1866_v13  ;;  %311 = vmatmul.bf16.gmra.mxu1 %v1553_v37 }
  0x64   :  { %712 = vmatpush.bf16.msra.mxu2 %v1843_v42  ;;  %701 = vmatpush.bf16.msra.mxu1 %v1859_v2 }
  0x66   :  { %690 = vmatpush.bf16.msra.mxu0 %v1819_v59 }
  0x67   :  { %629 = vmatpush.bf16.msra.mxu3 %v1873_v27 }
  0x68   :  { %713 = vmatpush.bf16.msra.mxu2 %v1849_v55  ;;  %702 = vmatpush.bf16.msra.mxu1 %v1870_v14 }
  0x6a   :  { %691 = vmatpush.bf16.msra.mxu0 %v1822_v9 }
  0x6b   :  { %630 = vmatpush.bf16.msra.mxu3 %v1882_v34  ;;  %340 = vmatmul.bf16.gmra.mxu2 %v1553_v37 }
  0x6c   :  { %714 = vmatpush.bf16.msra.mxu2 %v1855_v1  ;;  %703 = vmatpush.bf16.msra.mxu1 %v1877_v28 }
  0x6d   :  { %544 = vmatmul.bf16.vlgmr.msrb.gmra.mxu0 %v1754_v39  ;;  %v99_v39 = vld [vmem:[%s2219_s3] sm:$0x7] }
  0x6e   :  { %784 = vmatpush.bf16.msrb.mxu0 %v1826_v15  ;;  %v101_v40 = vperm.slane %v99_v39, 0  ;;  %v1966_v57 = vperm.slane %v99_v39, 1 }
  0x6f   :  { %771 = vmatpush.bf16.msrb.mxu3 %v1801_v7 }
  0x70   :  { %715 = vmatpush.bf16.msra.mxu2 %v1866_v13  ;;  %704 = vmatpush.bf16.msra.mxu1 %v1885_v35 }
  0x72   :  { %785 = vmatpush.bf16.msrb.mxu0 %v1838_v30 }
  0x73   :  { %772 = vmatpush.bf16.msrb.mxu3 %v1804_v11 }
  0x74   :  { %716 = vmatpush.bf16.msra.mxu2 %v1873_v27 }
  0x76   :  { %786 = vmatpush.bf16.msrb.mxu0 %v1846_v45 }
  0x77   :  { %773 = vmatpush.bf16.msrb.mxu3 %v1807_v17 }
  0x78   :  { %717 = vmatpush.bf16.msra.mxu2 %v1882_v34 }
  0x7a   :  { %787 = vmatpush.bf16.msrb.mxu0 %v1852_v56 }
  0x7b   :  { %774 = vmatpush.bf16.msrb.mxu3 %v1810_v24 }
  0x7e   :  { %788 = vmatpush.bf16.msrb.mxu0 %v1859_v2 }
  0x7f   :  { %775 = vmatpush.bf16.msrb.mxu3 %v1813_v36 }
  0x82   :  { %789 = vmatpush.bf16.msrb.mxu0 %v1870_v14 }
  0x83   :  { %776 = vmatpush.bf16.msrb.mxu3 %v1816_v47 }
  0x86   :  { %790 = vmatpush.bf16.msrb.mxu0 %v1877_v28 }
  0x87   :  { %777 = vmatpush.bf16.msrb.mxu3 %v1819_v59 }
  0x8a   :  { %791 = vmatpush.bf16.msrb.mxu0 %v1885_v35 }
  0x8b   :  { %778 = vmatpush.bf16.msrb.mxu3 %v1822_v9 }
  0xaa   :  { %v268_v38 = vpop.f32.mrf.mxu0 }
  0xab   :  { %v269_v46 = vadd.f32 %v268_v38, %v101_v40 }
  0xb0   :  { %v297_v58 = vpop.f32.mrf.mxu1 }
  0xb1   :  { %v519_v41 = vpop.f32.mrf.mxu3  ;;  %v298_v63 = vadd.f32 %v297_v58, %v1966_v57 }
  0xb2   :  { %v270_v43 = vpop.f32.mrf.mxu0  ;;  %v549_v50 = vadd.f32 %v519_v41, %v269_v46  ;;  %v1977_v41 = vperm.slane %v99_v39, 2 }
  0xb3   :  { %v1960_v44 = vadd.f32 %v270_v43, %v101_v40  ;;  %v1982_v43 = vld [vmem:[%s2220_s4] ss:$0 sm:$0xff] }
  0xb4   :  { %v1502_v52 = vmul.f32 -1.442695, %v549_v50 }
  0xb6   :  { %1617 = vpow2.f32 %v1502_v52 }
  0xb9   :  { %v521_v48 = vpop.f32.mrf.mxu3 }
  0xba   :  { %v273_v49 = vpop.f32.mrf.mxu0 }
  0xbb   :  { %v1962_v51 = vadd.f32 %v273_v49, %v101_v40 }
  0xbc   :  { %v1618_v60 = vpop.eup %1617 }
  0xbd   :  { %v553_v0 = vadd.f32 1.0, %v1618_v60 }
  0xbe   :  { %v326_v50 = vpop.f32.mrf.mxu2 }
  0xbf   :  { %1619 = vrcp.f32 %v553_v0  ;;  %v565_v38 = vand.u32 2147483648, %v553_v0  ;;  %vm559_vm1 = vweird.f32 %v553_v0  ;;  %v563_v46 = vand.u32 2147483647, %v553_v0 }
  0xc1   :  { %vm564_vm3 = vcmp.eq.f32.partialorder %v563_v46, 8.507059e+37 }
  0xc2   :  { %v275_v53 = vpop.f32.mrf.mxu0 }
  0xc3   :  { %v1964_v54 = vadd.f32 %v275_v53, %v101_v40  ;;  %v327_v53 = vadd.f32 %v326_v50, %v1977_v41 }
  0xc5   :  { %v1620_v12 = vpop.eup %1619 }
  0xc6   :  { %v555_v19 = vmul.f32 %v1620_v12, %v553_v0  ;;  %vm560_vm0 = vweird.f32 %v1620_v12 }
  0xc7   :  { %vm561_vm2 = vmor %vm559_vm1, %vm560_vm0 }
  0xc8   :  { %v556_v25 = vsub.f32 1.0, %v555_v19 }
  0xca   :  { %v278_v61 = vpop.f32.mrf.mxu0  ;;  %v557_v29 = vmul.f32 %v1620_v12, %v556_v25 }
  0xcb   :  { %v1968_v62 = vadd.f32 %v278_v61, %v101_v40 }
  0xcc   :  { %v558_v20 = vadd.f32 %v1620_v12, %v557_v29 }
  0xce   :  { %v562_v48 = vsel %vm561_vm2, %v1620_v12, %v558_v20 }
  0xd1   :  { %v532_v3 = vpop.f32.mrf.mxu3 }
  0xd2   :  { %v569_v4 = vadd.f32 %v532_v3, %v298_v63  ;;  %v280_v6 = vpop.f32.mrf.mxu0 }
  0xd3   :  { %v1971_v8 = vadd.f32 %v280_v6, %v101_v40 }
  0xd4   :  { %v1503_v5 = vmul.f32 -1.442695, %v569_v4 }
  0xd6   :  { %1621 = vpow2.f32 %v1503_v5 }
  0xd9   :  { %v534_v16 = vpop.f32.mrf.mxu3 }
  0xda   :  { %v283_v22 = vpop.f32.mrf.mxu0 }
  0xdb   :  { %v1973_v23 = vadd.f32 %v283_v22, %v101_v40 }
  0xdc   :  { %v1622_v18 = vpop.eup %1621 }
  0xdd   :  { %v573_v21 = vadd.f32 1.0, %v1622_v18 }
  0xdf   :  { %1623 = vrcp.f32 %v573_v21  ;;  %vm579_vm4 = vweird.f32 %v573_v21  ;;  %v585_v3 = vand.u32 2147483648, %v573_v21  ;;  %v583_v5 = vand.u32 2147483647, %v573_v21 }
  0xe1   :  { %v586_v6 = vor.u32 1.1754944e-38, %v585_v3  ;;  %vm584_vm7 = vcmp.eq.f32.partialorder %v583_v5, 8.507059e+37 }
  0xe2   :  { %v285_v31 = vpop.f32.mrf.mxu0 }
  0xe3   :  { %v1975_v33 = vadd.f32 %v285_v31, %v101_v40  ;;  %v566_v40 = vor.u32 1.1754944e-38, %v565_v38  ;;  %v328_v31 = vpop.f32.mrf.mxu2 }
  0xe5   :  { %v1624_v32 = vpop.eup %1623  ;;  %2224 = vst [vmem:[#allocation8_spill] sm:$0xff] %v1975_v33  ;;  %v567_v39 = vsel %vm564_vm3, %v566_v40, %v562_v48 }
  0xe6   :  { %v575_v37 = vmul.f32 %v1624_v32, %v573_v21  ;;  %vm580_vm5 = vweird.f32 %v1624_v32  ;;  %v299_v21 = vpop.f32.mrf.mxu1 }
  0xe7   :  { %vm581_vm6 = vmor %vm579_vm4, %vm580_vm5 }
  0xe8   :  { %v576_v49 = vsub.f32 1.0, %v575_v37 }
  0xea   :  { %v545_v52 = vpop.f32.mrf.mxu0  ;;  %v577_v61 = vmul.f32 %v1624_v32, %v576_v49 }
  0xeb   :  { %v589_v58 = vadd.f32 %v1982_v43, %v545_v52  ;;  %v2016_v20 = vpop.f32.mrf.mxu2 }
  0xec   :  { %v578_v4 = vadd.f32 %v1624_v32, %v577_v61 }
  0xed   :  { %v590_v60 = vmul.f32 %v589_v58, %v567_v39 }
  0xee   :  { %v582_v12 = vsel %vm581_vm6, %v1624_v32, %v578_v4  ;;  %v2014_v32 = vpop.f32.mrf.mxu1 }
  0xef   :  { %v591_v63 = vadd.f32 %v590_v60, %v327_v53  ;;  %v587_v19 = vsel %vm584_vm7, %v586_v6, %v582_v12 }
  0xf1   :  { %1625 = vtanh.f32 %v591_v63  ;;  %v300_v63 = vadd.f32 %v299_v21, %v1966_v57 }
  0xf2   :  { %v547_v0 = vpop.f32.mrf.mxu0 }
  0xf3   :  { %v2020_v38 = vpop.f32.mrf.mxu2 }
  0xf6   :  { %v2018_v37 = vpop.f32.mrf.mxu1 }
  0xf7   :  { %v1626_v16 = vpop.eup %1625 }
  0xf8   :  { %v593_v18 = vsub.f32 0.0, %v1626_v16 }
  0xfa   :  { %v594_v22 = vmul.f32 %v593_v18, %v587_v19 }
  0xfb   :  { %v2024_v48 = vpop.f32.mrf.mxu2 }
  0xfc   :  { %v1986_v25 = vadd.f32 %v1626_v16, %v594_v22 }
  0xfe   :  { %v596_v29 = vpack.c.bf16 %v1986_v25, %v1986_v25  ;;  %v2022_v46 = vpop.f32.mrf.mxu1 }
 0x100   :  { %605 = vmatmul.bf16.vlgmr.msrb.gmra.mxu1 %v596_v29  ;;  %618 = vmatmul.bf16.vlgmr.msrb.gmra.mxu2 %v596_v29 }
 0x101   :  { %631 = vmatmul.bf16.vlgmr.msra.gmra.mxu3 %v596_v29  ;;  %797 = vmatpush.bf16.msrb.mxu1 %v1824_v10 }
 0x102   :  { %858 = vmatpush.bf16.msrb.mxu2 %v1801_v7  ;;  %871 = vmatpush.bf16.msra.mxu3 %v1826_v15 }
 0x103   :  { %v2028_v50 = vpop.f32.mrf.mxu2 }
 0x105   :  { %798 = vmatpush.bf16.msrb.mxu1 %v1835_v26 }
 0x106   :  { %859 = vmatpush.bf16.msrb.mxu2 %v1804_v11  ;;  %872 = vmatpush.bf16.msra.mxu3 %v1838_v30  ;;  %v2026_v49 = vpop.f32.mrf.mxu1 }
 0x109   :  { %799 = vmatpush.bf16.msrb.mxu1 %v1843_v42 }
 0x10a   :  { %860 = vmatpush.bf16.msrb.mxu2 %v1807_v17  ;;  %873 = vmatpush.bf16.msra.mxu3 %v1846_v45 }
 0x10b   :  { %v2032_v40 = vpop.f32.mrf.mxu2 }
 0x10c   :  { %2225 = vst [vmem:[#allocation9_spill] sm:$0xff] %v2032_v40 }
 0x10d   :  { %800 = vmatpush.bf16.msrb.mxu1 %v1849_v55 }
 0x10e   :  { %861 = vmatpush.bf16.msrb.mxu2 %v1810_v24  ;;  %874 = vmatpush.bf16.msra.mxu3 %v1852_v56  ;;  %v2030_v52 = vpop.f32.mrf.mxu1 }
 0x111   :  { %801 = vmatpush.bf16.msrb.mxu1 %v1855_v1 }
 0x112   :  { %862 = vmatpush.bf16.msrb.mxu2 %v1813_v36  ;;  %875 = vmatpush.bf16.msra.mxu3 %v1859_v2 }
 0x113   :  { %v2036_v58 = vpop.f32.mrf.mxu2 }
 0x114   :  { %2227 = vst [vmem:[#allocation11_spill] sm:$0xff] %v2036_v58 }
 0x115   :  { %802 = vmatpush.bf16.msrb.mxu1 %v1866_v13 }
 0x116   :  { %863 = vmatpush.bf16.msrb.mxu2 %v1816_v47  ;;  %876 = vmatpush.bf16.msra.mxu3 %v1870_v14  ;;  %v2034_v53 = vpop.f32.mrf.mxu1 }
 0x117   :  { %2226 = vst [vmem:[#allocation10_spill] sm:$0xff] %v2034_v53 }
 0x119   :  { %803 = vmatpush.bf16.msrb.mxu1 %v1873_v27 }
 0x11a   :  { %864 = vmatpush.bf16.msrb.mxu2 %v1819_v59  ;;  %877 = vmatpush.bf16.msra.mxu3 %v1877_v28 }
 0x11d   :  { %804 = vmatpush.bf16.msrb.mxu1 %v1882_v34 }
 0x11e   :  { %865 = vmatpush.bf16.msrb.mxu2 %v1822_v9  ;;  %878 = vmatpush.bf16.msra.mxu3 %v1885_v35 }
 0x17d   :  { %v606_v39 = vpop.f32.mrf.mxu1 }
 0x17e   :  { %v636_v60 = vadd.f32 %v606_v39, %v1960_v44 }
 0x180   :  { %v1504_v61 = vmul.f32 -1.442695, %v636_v60 }
 0x182   :  { %1627 = vpow2.f32 %v1504_v61 }
 0x183   :  { %v619_v3 = vpop.f32.mrf.mxu2 }
 0x184   :  { %v656_v0 = vadd.f32 %v619_v3, %v300_v63  ;;  %v632_v4 = vpop.f32.mrf.mxu3 }
 0x185   :  { %v608_v5 = vpop.f32.mrf.mxu1 }
 0x186   :  { %v1505_v6 = vmul.f32 -1.442695, %v656_v0 }
 0x188   :  { %v1628_v12 = vpop.eup %1627  ;;  %1629 = vpow2.f32 %v1505_v6 }
 0x189   :  { %v640_v16 = vadd.f32 1.0, %v1628_v12 }
 0x18b   :  { %1631 = vrcp.f32 %v640_v16  ;;  %v621_v18 = vpop.f32.mrf.mxu2  ;;  %v652_v60 = vand.u32 2147483648, %v640_v16  ;;  %v650_v61 = vand.u32 2147483647, %v640_v16  ;;  %vm646_vm9 = vweird.f32 %v640_v16 }
 0x18c   :  { %v634_v19 = vpop.f32.mrf.mxu3  ;;  %v676_v18 = vadd.f32 %v1982_v43, %v632_v4 }
 0x18d   :  { %v653_v0 = vor.u32 1.1754944e-38, %v652_v60  ;;  %vm651_vm11 = vcmp.eq.f32.partialorder %v650_v61, 8.507059e+37 }
 0x18e   :  { %v1630_v22 = vpop.eup %1629 }
 0x18f   :  { %v660_v29 = vadd.f32 1.0, %v1630_v22  ;;  %v329_v22 = vadd.f32 %v328_v31, %v1977_v41 }
 0x191   :  { %v1632_v58 = vpop.eup %1631  ;;  %1633 = vrcp.f32 %v660_v29  ;;  %v672_v40 = vand.u32 2147483648, %v660_v29  ;;  %vm666_vm13 = vweird.f32 %v660_v29 }
 0x192   :  { %v642_v44 = vmul.f32 %v1632_v58, %v640_v16  ;;  %vm647_vm8 = vweird.f32 %v1632_v58 }
 0x193   :  { %vm648_vm10 = vmor %vm646_vm9, %vm647_vm8 }
 0x194   :  { %v643_v39 = vsub.f32 1.0, %v642_v44 }
 0x196   :  { %v644_v21 = vmul.f32 %v1632_v58, %v643_v39 }
 0x197   :  { %v1634_v63 = vpop.eup %1633 }
 0x198   :  { %v662_v3 = vmul.f32 %v1634_v63, %v660_v29  ;;  %v645_v5 = vadd.f32 %v1632_v58, %v644_v21  ;;  %vm667_vm12 = vweird.f32 %v1634_v63  ;;  %v670_v21 = vand.u32 2147483647, %v660_v29 }
 0x199   :  { %vm668_vm14 = vmor %vm666_vm13, %vm667_vm12 }
 0x19a   :  { %v663_v6 = vsub.f32 1.0, %v662_v3  ;;  %v649_v12 = vsel %vm648_vm10, %v1632_v58, %v645_v5  ;;  %v673_v3 = vor.u32 1.1754944e-38, %v672_v40  ;;  %vm671_vm15 = vcmp.eq.f32.partialorder %v670_v21, 8.507059e+37 }
 0x19b   :  { %v654_v19 = vsel %vm651_vm11, %v653_v0, %v649_v12 }
 0x19c   :  { %v677_v33 = vmul.f32 %v676_v18, %v654_v19  ;;  %v664_v44 = vmul.f32 %v1634_v63, %v663_v6 }
 0x19e   :  { %v678_v53 = vadd.f32 %v677_v33, %v329_v22  ;;  %v665_v39 = vadd.f32 %v1634_v63, %v664_v44 }
 0x1a0   :  { %1635 = vtanh.f32 %v678_v53  ;;  %v669_v16 = vsel %vm668_vm14, %v1634_v63, %v665_v39 }
 0x1a1   :  { %v674_v4 = vsel %vm671_vm15, %v673_v3, %v669_v16 }
 0x1a6   :  { %v1636_v60 = vpop.eup %1635 }
 0x1a7   :  { %v680_v58 = vsub.f32 %v1986_v25, %v1636_v60  ;;  %v303_v25 = vadd.f32 %v2014_v32, %v1966_v57 }
 0x1a9   :  { %v681_v61 = vmul.f32 %v680_v58, %v674_v4 }
 0x1ab   :  { %v2043_v5 = vadd.f32 %v1636_v60, %v681_v61 }
 0x1ad   :  { %v683_v33 = vpack.c.bf16 %v2043_v5, %v2043_v5 }
 0x1af   :  { %692 = vmatmul.bf16.vlgmr.msra.gmra.mxu0 %v683_v33  ;;  %705 = vmatmul.bf16.vlgmr.msra.gmra.mxu1 %v683_v33 }
 0x1b0   :  { %718 = vmatmul.bf16.vlgmr.msra.gmra.mxu2 %v683_v33  ;;  %884 = vmatpush.bf16.msra.mxu0 %v1824_v10 }
 0x1b1   :  { %945 = vmatpush.bf16.msra.mxu1 %v1801_v7  ;;  %958 = vmatpush.bf16.msra.mxu2 %v1826_v15 }
 0x1b4   :  { %885 = vmatpush.bf16.msra.mxu0 %v1835_v26 }
 0x1b5   :  { %946 = vmatpush.bf16.msra.mxu1 %v1804_v11  ;;  %959 = vmatpush.bf16.msra.mxu2 %v1838_v30 }
 0x1b8   :  { %886 = vmatpush.bf16.msra.mxu0 %v1843_v42 }
 0x1b9   :  { %947 = vmatpush.bf16.msra.mxu1 %v1807_v17  ;;  %960 = vmatpush.bf16.msra.mxu2 %v1846_v45 }
 0x1bc   :  { %887 = vmatpush.bf16.msra.mxu0 %v1849_v55 }
 0x1bd   :  { %948 = vmatpush.bf16.msra.mxu1 %v1810_v24  ;;  %961 = vmatpush.bf16.msra.mxu2 %v1852_v56 }
 0x1c0   :  { %888 = vmatpush.bf16.msra.mxu0 %v1855_v1 }
 0x1c1   :  { %949 = vmatpush.bf16.msra.mxu1 %v1813_v36  ;;  %962 = vmatpush.bf16.msra.mxu2 %v1859_v2 }
 0x1c4   :  { %889 = vmatpush.bf16.msra.mxu0 %v1866_v13 }
 0x1c5   :  { %950 = vmatpush.bf16.msra.mxu1 %v1816_v47  ;;  %963 = vmatpush.bf16.msra.mxu2 %v1870_v14 }
 0x1c8   :  { %890 = vmatpush.bf16.msra.mxu0 %v1873_v27 }
 0x1c9   :  { %951 = vmatpush.bf16.msra.mxu1 %v1819_v59  ;;  %964 = vmatpush.bf16.msra.mxu2 %v1877_v28 }
 0x1cc   :  { %891 = vmatpush.bf16.msra.mxu0 %v1882_v34 }
 0x1cd   :  { %952 = vmatpush.bf16.msra.mxu1 %v1822_v9  ;;  %965 = vmatpush.bf16.msra.mxu2 %v1885_v35 }
 0x22c   :  { %v693_v31 = vpop.f32.mrf.mxu0  ;;  %v706_v40 = vpop.f32.mrf.mxu1 }
 0x22d   :  { %v723_v53 = vadd.f32 %v693_v31, %v1962_v51  ;;  %v743_v29 = vadd.f32 %v706_v40, %v303_v25 }
 0x22f   :  { %v1506_v63 = vmul.f32 -1.442695, %v723_v53  ;;  %v1507_v0 = vmul.f32 -1.442695, %v743_v29 }
 0x231   :  { %1637 = vpow2.f32 %v1506_v63  ;;  %v332_v63 = vadd.f32 %v2016_v20, %v1977_v41 }
 0x232   :  { %1639 = vpow2.f32 %v1507_v0 }
 0x233   :  { %v719_v6 = vpop.f32.mrf.mxu2 }
 0x234   :  { %v695_v12 = vpop.f32.mrf.mxu0  ;;  %v708_v18 = vpop.f32.mrf.mxu1  ;;  %v763_v53 = vadd.f32 %v1982_v43, %v719_v6 }
 0x237   :  { %v1638_v19 = vpop.eup %1637 }
 0x238   :  { %v1640_v22 = vpop.eup %1639  ;;  %v727_v44 = vadd.f32 1.0, %v1638_v19 }
 0x239   :  { %v747_v39 = vadd.f32 1.0, %v1640_v22 }
 0x23a   :  { %1641 = vrcp.f32 %v727_v44  ;;  %v739_v58 = vand.u32 2147483648, %v727_v44  ;;  %v737_v61 = vand.u32 2147483647, %v727_v44  ;;  %vm733_vm1 = vweird.f32 %v727_v44 }
 0x23b   :  { %1643 = vrcp.f32 %v747_v39  ;;  %v721_v21 = vpop.f32.mrf.mxu2  ;;  %v759_v22 = vand.u32 2147483648, %v747_v39  ;;  %vm753_vm5 = vweird.f32 %v747_v39 }
 0x23c   :  { %v740_v31 = vor.u32 1.1754944e-38, %v739_v58  ;;  %vm738_vm3 = vcmp.eq.f32.partialorder %v737_v61, 8.507059e+37 }
 0x240   :  { %v1642_v32 = vpop.eup %1641 }
 0x241   :  { %v1644_v16 = vpop.eup %1643  ;;  %v729_v60 = vmul.f32 %v1642_v32, %v727_v44  ;;  %vm734_vm0 = vweird.f32 %v1642_v32  ;;  %v757_v44 = vand.u32 2147483647, %v747_v39 }
 0x242   :  { %v749_v51 = vmul.f32 %v1644_v16, %v747_v39  ;;  %vm735_vm2 = vmor %vm733_vm1, %vm734_vm0  ;;  %vm754_vm4 = vweird.f32 %v1644_v16 }
 0x243   :  { %v730_v3 = vsub.f32 1.0, %v729_v60  ;;  %vm755_vm6 = vmor %vm753_vm5, %vm754_vm4  ;;  %vm758_vm7 = vcmp.eq.f32.partialorder %v757_v44, 8.507059e+37 }
 0x244   :  { %v750_v25 = vsub.f32 1.0, %v749_v51 }
 0x245   :  { %v731_v4 = vmul.f32 %v1642_v32, %v730_v3 }
 0x246   :  { %v751_v12 = vmul.f32 %v1644_v16, %v750_v25 }
 0x247   :  { %v732_v33 = vadd.f32 %v1642_v32, %v731_v4 }
 0x248   :  { %v752_v19 = vadd.f32 %v1644_v16, %v751_v12 }
 0x249   :  { %v736_v40 = vsel %vm735_vm2, %v1642_v32, %v732_v33  ;;  %v760_v32 = vor.u32 1.1754944e-38, %v759_v22 }
 0x24a   :  { %v741_v29 = vsel %vm738_vm3, %v740_v31, %v736_v40  ;;  %v756_v21 = vsel %vm755_vm6, %v1644_v16, %v752_v19 }
 0x24b   :  { %v764_v0 = vmul.f32 %v763_v53, %v741_v29  ;;  %v761_v6 = vsel %vm758_vm7, %v760_v32, %v756_v21 }
 0x24d   :  { %v765_v18 = vadd.f32 %v764_v0, %v332_v63 }
 0x24f   :  { %1645 = vtanh.f32 %v765_v18 }
 0x255   :  { %v1646_v60 = vpop.eup %1645 }
 0x256   :  { %v767_v3 = vsub.f32 %v2043_v5, %v1646_v60  ;;  %v305_v5 = vadd.f32 %v2018_v37, %v1966_v57 }
 0x258   :  { %v768_v51 = vmul.f32 %v767_v3, %v761_v6 }
 0x25a   :  { %v2078_v58 = vadd.f32 %v1646_v60, %v768_v51 }
 0x25c   :  { %v770_v20 = vpack.c.bf16 %v2078_v58, %v2078_v58 }
 0x25e   :  { %779 = vmatmul.bf16.vlgmr.msrb.gmra.mxu3 %v770_v20  ;;  %792 = vmatmul.bf16.vlgmr.msrb.gmra.mxu0 %v770_v20 }
 0x25f   :  { %805 = vmatmul.bf16.vlgmr.msrb.gmra.mxu1 %v770_v20  ;;  %971 = vmatpush.bf16.msrb.mxu3 %v1824_v10 }
 0x260   :  { %1032 = vmatpush.bf16.msrb.mxu0 %v1801_v7  ;;  %1045 = vmatpush.bf16.msrb.mxu1 %v1826_v15 }
 0x263   :  { %972 = vmatpush.bf16.msrb.mxu3 %v1835_v26 }
 0x264   :  { %1033 = vmatpush.bf16.msrb.mxu0 %v1804_v11  ;;  %1046 = vmatpush.bf16.msrb.mxu1 %v1838_v30 }
 0x267   :  { %973 = vmatpush.bf16.msrb.mxu3 %v1843_v42 }
 0x268   :  { %1034 = vmatpush.bf16.msrb.mxu0 %v1807_v17  ;;  %1047 = vmatpush.bf16.msrb.mxu1 %v1846_v45 }
 0x26b   :  { %974 = vmatpush.bf16.msrb.mxu3 %v1849_v55 }
 0x26c   :  { %1035 = vmatpush.bf16.msrb.mxu0 %v1810_v24  ;;  %1048 = vmatpush.bf16.msrb.mxu1 %v1852_v56 }
 0x26f   :  { %975 = vmatpush.bf16.msrb.mxu3 %v1855_v1 }
 0x270   :  { %1036 = vmatpush.bf16.msrb.mxu0 %v1813_v36  ;;  %1049 = vmatpush.bf16.msrb.mxu1 %v1859_v2 }
 0x273   :  { %976 = vmatpush.bf16.msrb.mxu3 %v1866_v13 }
 0x274   :  { %1037 = vmatpush.bf16.msrb.mxu0 %v1816_v47  ;;  %1050 = vmatpush.bf16.msrb.mxu1 %v1870_v14 }
 0x277   :  { %977 = vmatpush.bf16.msrb.mxu3 %v1873_v27 }
 0x278   :  { %1038 = vmatpush.bf16.msrb.mxu0 %v1819_v59  ;;  %1051 = vmatpush.bf16.msrb.mxu1 %v1877_v28 }
 0x27b   :  { %978 = vmatpush.bf16.msrb.mxu3 %v1882_v34 }
 0x27c   :  { %1039 = vmatpush.bf16.msrb.mxu0 %v1822_v9  ;;  %1052 = vmatpush.bf16.msrb.mxu1 %v1885_v35 }
 0x2db   :  { %v793_v39 = vpop.f32.mrf.mxu0 }
 0x2dc   :  { %v830_v16 = vadd.f32 %v793_v39, %v305_v5  ;;  %v806_v4 = vpop.f32.mrf.mxu1 }
 0x2dd   :  { %v850_v20 = vadd.f32 %v1982_v43, %v806_v4 }
 0x2de   :  { %v1509_v61 = vmul.f32 -1.442695, %v830_v16  ;;  %v334_v16 = vadd.f32 %v2020_v38, %v1977_v41 }
 0x2e0   :  { %1647 = vpow2.f32 %v1509_v61 }
 0x2e1   :  { %v780_v33 = vpop.f32.mrf.mxu3 }
 0x2e2   :  { %v810_v25 = vadd.f32 %v780_v33, %v1964_v54 }
 0x2e3   :  { %v795_v31 = vpop.f32.mrf.mxu0 }
 0x2e4   :  { %v1508_v40 = vmul.f32 -1.442695, %v810_v25  ;;  %v808_v53 = vpop.f32.mrf.mxu1 }
 0x2e6   :  { %1649 = vpow2.f32 %v1508_v40  ;;  %v1648_v29 = vpop.eup %1647 }
 0x2e7   :  { %v834_v12 = vadd.f32 1.0, %v1648_v29 }
 0x2e9   :  { %v782_v63 = vpop.f32.mrf.mxu3  ;;  %v846_v40 = vand.u32 2147483648, %v834_v12  ;;  %vm840_vm13 = vweird.f32 %v834_v12  ;;  %v844_v53 = vand.u32 2147483647, %v834_v12 }
 0x2eb   :  { %vm845_vm15 = vcmp.eq.f32.partialorder %v844_v53, 8.507059e+37 }
 0x2ec   :  { %v1650_v0 = vpop.eup %1649 }
 0x2ed   :  { %v814_v18 = vadd.f32 1.0, %v1650_v0  ;;  %v847_v0 = vor.u32 1.1754944e-38, %v846_v40 }
 0x2ef   :  { %1651 = vrcp.f32 %v814_v18  ;;  %v826_v60 = vand.u32 2147483648, %v814_v18  ;;  %v824_v54 = vand.u32 2147483647, %v814_v18  ;;  %vm820_vm9 = vweird.f32 %v814_v18 }
 0x2f0   :  { %1653 = vrcp.f32 %v834_v12 }
 0x2f1   :  { %v827_v51 = vor.u32 1.1754944e-38, %v826_v60  ;;  %vm825_vm11 = vcmp.eq.f32.partialorder %v824_v54, 8.507059e+37 }
 0x2f5   :  { %v1652_v37 = vpop.eup %1651 }
 0x2f6   :  { %v1654_v19 = vpop.eup %1653  ;;  %v816_v22 = vmul.f32 %v1652_v37, %v814_v18  ;;  %vm821_vm8 = vweird.f32 %v1652_v37 }
 0x2f7   :  { %v836_v21 = vmul.f32 %v1654_v19, %v834_v12  ;;  %vm822_vm10 = vmor %vm820_vm9, %vm821_vm8  ;;  %vm841_vm12 = vweird.f32 %v1654_v19 }
 0x2f8   :  { %v817_v44 = vsub.f32 1.0, %v816_v22  ;;  %vm842_vm14 = vmor %vm840_vm13, %vm841_vm12 }
 0x2f9   :  { %v837_v6 = vsub.f32 1.0, %v836_v21 }
 0x2fa   :  { %v818_v32 = vmul.f32 %v1652_v37, %v817_v44 }
 0x2fb   :  { %v838_v33 = vmul.f32 %v1654_v19, %v837_v6 }
 0x2fc   :  { %v819_v3 = vadd.f32 %v1652_v37, %v818_v32 }
 0x2fd   :  { %v839_v31 = vadd.f32 %v1654_v19, %v838_v33 }
 0x2fe   :  { %v823_v5 = vsel %vm822_vm10, %v1652_v37, %v819_v3 }
 0x2ff   :  { %v828_v39 = vsel %vm825_vm11, %v827_v51, %v823_v5  ;;  %v843_v29 = vsel %vm842_vm14, %v1654_v19, %v839_v31 }
 0x300   :  { %v851_v61 = vmul.f32 %v850_v20, %v828_v39  ;;  %v848_v18 = vsel %vm845_vm15, %v847_v0, %v843_v29  ;;  %v337_v20 = vadd.f32 %v2024_v48, %v1977_v41 }
 0x302   :  { %v852_v25 = vadd.f32 %v851_v61, %v334_v16 }
 0x304   :  { %1655 = vtanh.f32 %v852_v25 }
 0x30a   :  { %v1656_v63 = vpop.eup %1655 }
 0x30b   :  { %v854_v4 = vsub.f32 %v2078_v58, %v1656_v63 }
 0x30d   :  { %v855_v37 = vmul.f32 %v854_v4, %v848_v18 }
 0x30f   :  { %v2113_v22 = vadd.f32 %v1656_v63, %v855_v37 }
 0x311   :  { %v857_v38 = vpack.c.bf16 %v2113_v22, %v2113_v22 }
 0x313   :  { %866 = vmatmul.bf16.vlgmr.msrb.gmra.mxu2 %v857_v38  ;;  %879 = vmatmul.bf16.vlgmr.msra.gmra.mxu3 %v857_v38 }
 0x314   :  { %892 = vmatmul.bf16.vlgmr.msra.gmra.mxu0 %v857_v38  ;;  %1058 = vmatpush.bf16.msrb.mxu2 %v1824_v10 }
 0x315   :  { %1119 = vmatpush.bf16.msra.mxu3 %v1801_v7  ;;  %1132 = vmatpush.bf16.msra.mxu0 %v1826_v15 }
 0x318   :  { %1059 = vmatpush.bf16.msrb.mxu2 %v1835_v26 }
 0x319   :  { %1120 = vmatpush.bf16.msra.mxu3 %v1804_v11  ;;  %1133 = vmatpush.bf16.msra.mxu0 %v1838_v30  ;;  %v308_v11 = vadd.f32 %v2022_v46, %v1966_v57 }
 0x31c   :  { %1060 = vmatpush.bf16.msrb.mxu2 %v1843_v42 }
 0x31d   :  { %1121 = vmatpush.bf16.msra.mxu3 %v1807_v17  ;;  %1134 = vmatpush.bf16.msra.mxu0 %v1846_v45 }
 0x320   :  { %1061 = vmatpush.bf16.msrb.mxu2 %v1849_v55 }
 0x321   :  { %1122 = vmatpush.bf16.msra.mxu3 %v1810_v24  ;;  %1135 = vmatpush.bf16.msra.mxu0 %v1852_v56 }
 0x324   :  { %1062 = vmatpush.bf16.msrb.mxu2 %v1855_v1 }
 0x325   :  { %1123 = vmatpush.bf16.msra.mxu3 %v1813_v36  ;;  %1136 = vmatpush.bf16.msra.mxu0 %v1859_v2 }
 0x328   :  { %1063 = vmatpush.bf16.msrb.mxu2 %v1866_v13 }
 0x329   :  { %1124 = vmatpush.bf16.msra.mxu3 %v1816_v47  ;;  %1137 = vmatpush.bf16.msra.mxu0 %v1870_v14 }
 0x32c   :  { %1064 = vmatpush.bf16.msrb.mxu2 %v1873_v27 }
 0x32d   :  { %1125 = vmatpush.bf16.msra.mxu3 %v1819_v59  ;;  %1138 = vmatpush.bf16.msra.mxu0 %v1877_v28 }
 0x330   :  { %1065 = vmatpush.bf16.msrb.mxu2 %v1882_v34 }
 0x331   :  { %1126 = vmatpush.bf16.msra.mxu3 %v1822_v9  ;;  %1139 = vmatpush.bf16.msra.mxu0 %v1885_v35 }
 0x391   :  { %v893_v7 = vpop.f32.mrf.mxu0 }
 0x392   :  { %v937_v3 = vadd.f32 %v1982_v43, %v893_v7 }
 0x396   :  { %v867_v17 = vpop.f32.mrf.mxu2  ;;  %v880_v24 = vpop.f32.mrf.mxu3 }
 0x397   :  { %v897_v36 = vadd.f32 %v867_v17, %v1968_v62  ;;  %v917_v47 = vadd.f32 %v880_v24, %v308_v11 }
 0x399   :  { %v1510_v15 = vmul.f32 -1.442695, %v897_v36  ;;  %v1511_v30 = vmul.f32 -1.442695, %v917_v47  ;;  %v895_v59 = vpop.f32.mrf.mxu0 }
 0x39b   :  { %1657 = vpow2.f32 %v1510_v15 }
 0x39c   :  { %1659 = vpow2.f32 %v1511_v30 }
 0x39e   :  { %v869_v45 = vpop.f32.mrf.mxu2  ;;  %v882_v56 = vpop.f32.mrf.mxu3 }
 0x3a1   :  { %v1658_v2 = vpop.eup %1657 }
 0x3a2   :  { %v1660_v9 = vpop.eup %1659  ;;  %v901_v14 = vadd.f32 1.0, %v1658_v2 }
 0x3a3   :  { %v921_v28 = vadd.f32 1.0, %v1660_v9 }
 0x3a4   :  { %1661 = vrcp.f32 %v901_v14  ;;  %v913_v19 = vand.u32 2147483648, %v901_v14  ;;  %v911_v21 = vand.u32 2147483647, %v901_v14  ;;  %vm907_vm1 = vweird.f32 %v901_v14 }
 0x3a5   :  { %1663 = vrcp.f32 %v921_v28  ;;  %v933_v33 = vand.u32 2147483648, %v921_v28  ;;  %vm927_vm5 = vweird.f32 %v921_v28  ;;  %v931_v25 = vand.u32 2147483647, %v921_v28 }
 0x3a6   :  { %v914_v32 = vor.u32 1.1754944e-38, %v913_v19  ;;  %vm912_vm3 = vcmp.eq.f32.partialorder %v911_v21, 8.507059e+37 }
 0x3a7   :  { %v934_v53 = vor.u32 1.1754944e-38, %v933_v33  ;;  %vm932_vm7 = vcmp.eq.f32.partialorder %v931_v25, 8.507059e+37 }
 0x3aa   :  { %v1662_v35 = vpop.eup %1661 }
 0x3ab   :  { %v1664_v46 = vpop.eup %1663  ;;  %v903_v58 = vmul.f32 %v1662_v35, %v901_v14  ;;  %vm908_vm0 = vweird.f32 %v1662_v35 }
 0x3ac   :  { %v923_v62 = vmul.f32 %v1664_v46, %v921_v28  ;;  %vm909_vm2 = vmor %vm907_vm1, %vm908_vm0  ;;  %vm928_vm4 = vweird.f32 %v1664_v46 }
 0x3ad   :  { %v904_v12 = vsub.f32 1.0, %v903_v58  ;;  %vm929_vm6 = vmor %vm927_vm5, %vm928_vm4 }
 0x3ae   :  { %v924_v54 = vsub.f32 1.0, %v923_v62 }
 0x3af   :  { %v905_v44 = vmul.f32 %v1662_v35, %v904_v12 }
 0x3b0   :  { %v925_v39 = vmul.f32 %v1664_v46, %v924_v54 }
 0x3b1   :  { %v906_v60 = vadd.f32 %v1662_v35, %v905_v44 }
 0x3b2   :  { %v926_v61 = vadd.f32 %v1664_v46, %v925_v39 }
 0x3b3   :  { %v910_v6 = vsel %vm909_vm2, %v1662_v35, %v906_v60  ;;  %v339_v35 = vadd.f32 %v2028_v50, %v1977_v41 }
 0x3b4   :  { %v915_v51 = vsel %vm912_vm3, %v914_v32, %v910_v6  ;;  %v930_v31 = vsel %vm929_vm6, %v1664_v46, %v926_v61 }
 0x3b5   :  { %v938_v5 = vmul.f32 %v937_v3, %v915_v51  ;;  %v935_v63 = vsel %vm932_vm7, %v934_v53, %v930_v31 }
 0x3b7   :  { %v939_v16 = vadd.f32 %v938_v5, %v337_v20  ;;  %v313_v20 = vadd.f32 %v2030_v52, %v1966_v57 }
 0x3b9   :  { %1665 = vtanh.f32 %v939_v16 }
 0x3bf   :  { %v1666_v40 = vpop.eup %1665 }
 0x3c0   :  { %v941_v29 = vsub.f32 %v2113_v22, %v1666_v40 }
 0x3c2   :  { %v942_v0 = vmul.f32 %v941_v29, %v935_v63 }
 0x3c4   :  { %v2148_v4 = vadd.f32 %v1666_v40, %v942_v0 }
 0x3c6   :  { %v944_v48 = vpack.c.bf16 %v2148_v4, %v2148_v4 }
 0x3c8   :  { %953 = vmatmul.bf16.vlgmr.msra.gmra.mxu1 %v944_v48  ;;  %966 = vmatmul.bf16.vlgmr.msra.gmra.mxu2 %v944_v48 }
 0x3c9   :  { %979 = vmatmul.bf16.vlgmr.msrb.gmra.mxu3 %v944_v48  ;;  %1145 = vmatpush.bf16.msra.mxu1 %v1824_v10  ;;  %v310_v10 = vadd.f32 %v2026_v49, %v1966_v57 }
 0x3cd   :  { %1146 = vmatpush.bf16.msra.mxu1 %v1835_v26 }
 0x3d1   :  { %1147 = vmatpush.bf16.msra.mxu1 %v1843_v42 }
 0x3d5   :  { %1148 = vmatpush.bf16.msra.mxu1 %v1849_v55 }
 0x3d9   :  { %1149 = vmatpush.bf16.msra.mxu1 %v1855_v1 }
 0x3dd   :  { %1150 = vmatpush.bf16.msra.mxu1 %v1866_v13 }
 0x3e1   :  { %1151 = vmatpush.bf16.msra.mxu1 %v1873_v27 }
 0x3e5   :  { %1152 = vmatpush.bf16.msra.mxu1 %v1882_v34 }
 0x445   :  { %v954_v18 = vpop.f32.mrf.mxu1 }
 0x446   :  { %v984_v37 = vadd.f32 %v954_v18, %v1971_v8 }
 0x448   :  { %v1512_v22 = vmul.f32 -1.442695, %v984_v37 }
 0x44a   :  { %1667 = vpow2.f32 %v1512_v22 }
 0x44b   :  { %v967_v26 = vpop.f32.mrf.mxu2 }
 0x44c   :  { %v1004_v42 = vadd.f32 %v967_v26, %v310_v10  ;;  %v980_v38 = vpop.f32.mrf.mxu3 }
 0x44d   :  { %v956_v55 = vpop.f32.mrf.mxu1  ;;  %v1024_v14 = vadd.f32 %v1982_v43, %v980_v38 }
 0x44e   :  { %v1513_v7 = vmul.f32 -1.442695, %v1004_v42 }
 0x450   :  { %v1668_v1 = vpop.eup %1667  ;;  %1669 = vpow2.f32 %v1513_v7 }
 0x451   :  { %v988_v13 = vadd.f32 1.0, %v1668_v1 }
 0x453   :  { %1671 = vrcp.f32 %v988_v13  ;;  %v969_v27 = vpop.f32.mrf.mxu2  ;;  %v1000_v47 = vand.u32 2147483648, %v988_v13  ;;  %v998_v15 = vand.u32 2147483647, %v988_v13  ;;  %vm994_vm9 = vweird.f32 %v988_v13 }
 0x454   :  { %v982_v11 = vpop.f32.mrf.mxu3 }
 0x455   :  { %v1001_v56 = vor.u32 1.1754944e-38, %v1000_v47  ;;  %vm999_vm11 = vcmp.eq.f32.partialorder %v998_v15, 8.507059e+37  ;;  %v2228_v11 = vld [vmem:[#allocation9_spill] sm:$0xff] }
 0x456   :  { %v1670_v34 = vpop.eup %1669 }
 0x457   :  { %v1008_v17 = vadd.f32 1.0, %v1670_v34  ;;  %v342_v34 = vadd.f32 %v2228_v11, %v1977_v41 }
 0x459   :  { %v1672_v24 = vpop.eup %1671  ;;  %1673 = vrcp.f32 %v1008_v17  ;;  %v1020_v62 = vand.u32 2147483648, %v1008_v17  ;;  %vm1014_vm13 = vweird.f32 %v1008_v17  ;;  %v1018_v44 = vand.u32 2147483647, %v1008_v17 }
 0x45a   :  { %v990_v8 = vmul.f32 %v1672_v24, %v988_v13  ;;  %vm995_vm8 = vweird.f32 %v1672_v24 }
 0x45b   :  { %vm996_vm10 = vmor %vm994_vm9, %vm995_vm8  ;;  %v1021_v32 = vor.u32 1.1754944e-38, %v1020_v62  ;;  %vm1019_vm15 = vcmp.eq.f32.partialorder %v1018_v44, 8.507059e+37  ;;  %v1607_v62 = vld [vmem:[%s2221_s5 + $0x28] sm:$0xff]  ;;  %v1606_v44 = vld [vmem:[%s2221_s5 + $0x20] sm:$0xff] }
 0x45c   :  { %v991_v36 = vsub.f32 1.0, %v990_v8 }
 0x45e   :  { %v992_v49 = vmul.f32 %v1672_v24, %v991_v36 }
 0x45f   :  { %v1674_v30 = vpop.eup %1673 }
 0x460   :  { %v1010_v59 = vmul.f32 %v1674_v30, %v1008_v17  ;;  %v993_v45 = vadd.f32 %v1672_v24, %v992_v49  ;;  %vm1015_vm12 = vweird.f32 %v1674_v30 }
 0x461   :  { %vm1016_vm14 = vmor %vm1014_vm13, %vm1015_vm12 }
 0x462   :  { %v1011_v2 = vsub.f32 1.0, %v1010_v59  ;;  %v997_v9 = vsel %vm996_vm10, %v1672_v24, %v993_v45 }
 0x463   :  { %v1002_v28 = vsel %vm999_vm11, %v1001_v56, %v997_v9 }
 0x464   :  { %v1025_v46 = vmul.f32 %v1024_v14, %v1002_v28  ;;  %v1012_v58 = vmul.f32 %v1674_v30, %v1011_v2  ;;  %v1609_v14 = vld [vmem:[%s2221_s5 + $0x38] sm:$0xff]  ;;  %v1608_v28 = vld [vmem:[%s2221_s5 + $0x30] sm:$0xff] }
 0x465   :  { %1274 = vmatpush.bf16.msra.mxu2 %v1609_v14 }
 0x466   :  { %v1026_v12 = vadd.f32 %v1025_v46, %v339_v35  ;;  %v1013_v19 = vadd.f32 %v1674_v30, %v1012_v58  ;;  %v2229_v35 = vld [vmem:[#allocation10_spill] sm:$0xff] }
 0x467   :  { %v315_v46 = vadd.f32 %v2229_v35, %v1966_v57  ;;  %v1605_v57 = vld [vmem:[%s2221_s5 + $0x18] sm:$0xff] }
 0x468   :  { %1675 = vtanh.f32 %v1026_v12  ;;  %v1017_v21 = vsel %vm1016_vm14, %v1674_v30, %v1013_v19 }
 0x469   :  { %v1022_v3 = vsel %vm1019_vm15, %v1021_v32, %v1017_v21  ;;  %1275 = vmatpush.bf16.msra.mxu2 %v1608_v28  ;;  %v2230_v32 = vld [vmem:[#allocation8_spill] sm:$0xff] }
 0x46d   :  { %1276 = vmatpush.bf16.msra.mxu2 %v1607_v62 }
 0x46e   :  { %v1676_v60 = vpop.eup %1675 }
 0x46f   :  { %v1028_v54 = vsub.f32 %v2148_v4, %v1676_v60 }
 0x471   :  { %v1029_v6 = vmul.f32 %v1028_v54, %v1022_v3  ;;  %1277 = vmatpush.bf16.msra.mxu2 %v1606_v44 }
 0x473   :  { %v1030_v51 = vadd.f32 %v1676_v60, %v1029_v6 }
 0x475   :  { %v1031_v50 = vpack.c.bf16 %v1030_v51, %v1030_v51  ;;  %1278 = vmatpush.bf16.msra.mxu2 %v1605_v57 }
 0x477   :  { %1040 = vmatmul.bf16.vlgmr.msrb.gmra.mxu0 %v1031_v50  ;;  %1053 = vmatmul.bf16.vlgmr.msrb.gmra.mxu1 %v1031_v50 }
 0x478   :  { %1066 = vmatmul.bf16.vlgmr.msrb.gmra.mxu2 %v1031_v50  ;;  %v1604_v50 = vld [vmem:[%s2221_s5 + $0x10] sm:$0xff] }
 0x479   :  { %1279 = vmatpush.bf16.msra.mxu2 %v1604_v50 }
 0x4f4   :  { %v1041_v5 = vpop.f32.mrf.mxu0  ;;  %v1054_v39 = vpop.f32.mrf.mxu1 }
 0x4f5   :  { %v1071_v16 = vadd.f32 %v1041_v5, %v1973_v23  ;;  %v1091_v61 = vadd.f32 %v1054_v39, %v313_v20  ;;  %v1603_v39 = vld [vmem:[%s2221_s5 + $0x8] sm:$0xff] }
 0x4f6   :  { %1280 = vmatpush.bf16.msra.mxu2 %v1603_v39 }
 0x4f7   :  { %v1514_v33 = vmul.f32 -1.442695, %v1071_v16  ;;  %v1515_v25 = vmul.f32 -1.442695, %v1091_v61 }
 0x4f9   :  { %1677 = vpow2.f32 %v1514_v33 }
 0x4fa   :  { %1679 = vpow2.f32 %v1515_v25  ;;  %v1602_v25 = vld [vmem:[%s2221_s5] sm:$0xff] }
 0x4fb   :  { %v1067_v31 = vpop.f32.mrf.mxu2  ;;  %1281 = vmatpush.bf16.msra.mxu2 %v1602_v25 }
 0x4fc   :  { %v1043_v40 = vpop.f32.mrf.mxu0  ;;  %v1056_v53 = vpop.f32.mrf.mxu1  ;;  %v1111_v13 = vadd.f32 %v1982_v43, %v1067_v31 }
 0x4ff   :  { %v1678_v29 = vpop.eup %1677 }
 0x500   :  { %v1680_v63 = vpop.eup %1679  ;;  %v1075_v0 = vadd.f32 1.0, %v1678_v29 }
 0x501   :  { %v1095_v4 = vadd.f32 1.0, %v1680_v63 }
 0x502   :  { %1681 = vrcp.f32 %v1075_v0  ;;  %v1087_v10 = vand.u32 2147483648, %v1075_v0  ;;  %v1085_v42 = vand.u32 2147483647, %v1075_v0  ;;  %vm1081_vm1 = vweird.f32 %v1075_v0 }
 0x503   :  { %1683 = vrcp.f32 %v1095_v4  ;;  %v1069_v48 = vpop.f32.mrf.mxu2  ;;  %v1107_v47 = vand.u32 2147483648, %v1095_v4  ;;  %vm1101_vm5 = vweird.f32 %v1095_v4  ;;  %v1105_v49 = vand.u32 2147483647, %v1095_v4 }
 0x504   :  { %v1088_v7 = vor.u32 1.1754944e-38, %v1087_v10  ;;  %vm1086_vm3 = vcmp.eq.f32.partialorder %v1085_v42, 8.507059e+37  ;;  %v2231_v42 = vld [vmem:[#allocation11_spill] sm:$0xff] }
 0x505   :  { %v1108_v59 = vor.u32 1.1754944e-38, %v1107_v47  ;;  %vm1106_vm7 = vcmp.eq.f32.partialorder %v1105_v49, 8.507059e+37 }
 0x508   :  { %v1682_v52 = vpop.eup %1681 }
 0x509   :  { %v1684_v18 = vpop.eup %1683  ;;  %v1077_v37 = vmul.f32 %v1682_v52, %v1075_v0  ;;  %vm1082_vm0 = vweird.f32 %v1682_v52 }
 0x50a   :  { %v1097_v23 = vmul.f32 %v1684_v18, %v1095_v4  ;;  %vm1083_vm2 = vmor %vm1081_vm1, %vm1082_vm0  ;;  %vm1102_vm4 = vweird.f32 %v1684_v18 }
 0x50b   :  { %v1078_v22 = vsub.f32 1.0, %v1077_v37  ;;  %vm1103_vm6 = vmor %vm1101_vm5, %vm1102_vm4 }
 0x50c   :  { %v1098_v55 = vsub.f32 1.0, %v1097_v23 }
 0x50d   :  { %v1079_v26 = vmul.f32 %v1682_v52, %v1078_v22  ;;  %v1697_v22 = vld [vmem:[%s2220_s4] ss:$0 sm:$0xff] }
 0x50e   :  { %v1099_v24 = vmul.f32 %v1684_v18, %v1098_v55 }
 0x50f   :  { %v1080_v38 = vadd.f32 %v1682_v52, %v1079_v26 }
 0x510   :  { %v1100_v36 = vadd.f32 %v1684_v18, %v1099_v24 }
 0x511   :  { %v1084_v1 = vsel %vm1083_vm2, %v1682_v52, %v1080_v38  ;;  %v344_v38 = vadd.f32 %v2231_v42, %v1977_v41 }
 0x512   :  { %v1089_v27 = vsel %vm1086_vm3, %v1088_v7, %v1084_v1  ;;  %v1104_v15 = vsel %vm1103_vm6, %v1684_v18, %v1100_v36 }
 0x513   :  { %v1112_v17 = vmul.f32 %v1111_v13, %v1089_v27  ;;  %v1109_v43 = vsel %vm1106_vm7, %v1108_v59, %v1104_v15  ;;  %v1616_v15 = vld [vmem:[%s2222_s6] ss:$0 sm:$0xff] }
 0x515   :  { %v1113_v8 = vadd.f32 %v1112_v17, %v342_v34 }
 0x517   :  { %1685 = vtanh.f32 %v1113_v8 }
 0x51d   :  { %v1686_v30 = vpop.eup %1685 }
 0x51e   :  { %v1115_v45 = vsub.f32 %v1030_v51, %v1686_v30 }
 0x520   :  { %v1116_v56 = vmul.f32 %v1115_v45, %v1109_v43 }
 0x522   :  { %v2173_v2 = vadd.f32 %v1686_v30, %v1116_v56 }
 0x524   :  { %v1118_v9 = vpack.c.bf16 %v2173_v2, %v2173_v2 }
 0x526   :  { %1127 = vmatmul.bf16.vlgmr.msra.gmra.mxu3 %v1118_v9  ;;  %1140 = vmatmul.bf16.vlgmr.msra.gmra.mxu0 %v1118_v9 }
 0x527   :  { %1153 = vmatmul.bf16.vlgmr.msra.gmra.mxu1 %v1118_v9 }
 0x5a3   :  { %v1141_v58 = vpop.f32.mrf.mxu0 }
 0x5a4   :  { %v1178_v12 = vadd.f32 %v1141_v58, %v315_v46  ;;  %v1154_v19 = vpop.f32.mrf.mxu1 }
 0x5a5   :  { %v1198_v23 = vadd.f32 %v1697_v22, %v1154_v19 }
 0x5a6   :  { %v1517_v21 = vmul.f32 -1.442695, %v1178_v12 }
 0x5a8   :  { %1687 = vpow2.f32 %v1517_v21 }
 0x5a9   :  { %v1128_v60 = vpop.f32.mrf.mxu3 }
 0x5aa   :  { %v1158_v54 = vadd.f32 %v1128_v60, %v2230_v32 }
 0x5ab   :  { %v1143_v3 = vpop.f32.mrf.mxu0 }
 0x5ac   :  { %v1516_v6 = vmul.f32 -1.442695, %v1158_v54  ;;  %v1156_v51 = vpop.f32.mrf.mxu1 }
 0x5ae   :  { %1689 = vpow2.f32 %v1516_v6  ;;  %v1688_v20 = vpop.eup %1687 }
 0x5af   :  { %v1182_v61 = vadd.f32 1.0, %v1688_v20 }
 0x5b1   :  { %v1130_v5 = vpop.f32.mrf.mxu3  ;;  %v1194_v27 = vand.u32 2147483648, %v1182_v61  ;;  %vm1188_vm13 = vweird.f32 %v1182_v61  ;;  %v1192_v11 = vand.u32 2147483647, %v1182_v61 }
 0x5b3   :  { %v1195_v24 = vor.u32 1.1754944e-38, %v1194_v27  ;;  %vm1193_vm15 = vcmp.eq.f32.partialorder %v1192_v11, 8.507059e+37 }
 0x5b4   :  { %v1690_v16 = vpop.eup %1689 }
 0x5b5   :  { %v1162_v33 = vadd.f32 1.0, %v1690_v16 }
 0x5b7   :  { %1691 = vrcp.f32 %v1162_v33  ;;  %v1174_v0 = vand.u32 2147483648, %v1162_v33  ;;  %v1172_v48 = vand.u32 2147483647, %v1162_v33  ;;  %vm1168_vm9 = vweird.f32 %v1162_v33 }
 0x5b8   :  { %1693 = vrcp.f32 %v1182_v61 }
 0x5b9   :  { %v1175_v37 = vor.u32 1.1754944e-38, %v1174_v0  ;;  %vm1173_vm11 = vcmp.eq.f32.partialorder %v1172_v48, 8.507059e+37 }
 0x5bd   :  { %v1692_v31 = vpop.eup %1691 }
 0x5be   :  { %v1694_v40 = vpop.eup %1693  ;;  %v1164_v53 = vmul.f32 %v1692_v31, %v1162_v33  ;;  %vm1169_vm8 = vweird.f32 %v1692_v31 }
 0x5bf   :  { %v1184_v63 = vmul.f32 %v1694_v40, %v1182_v61  ;;  %vm1170_vm10 = vmor %vm1168_vm9, %vm1169_vm8  ;;  %vm1189_vm12 = vweird.f32 %v1694_v40 }
 0x5c0   :  { %v1165_v29 = vsub.f32 1.0, %v1164_v53  ;;  %vm1190_vm14 = vmor %vm1188_vm13, %vm1189_vm12 }
 0x5c1   :  { %v1185_v18 = vsub.f32 1.0, %v1184_v63 }
 0x5c2   :  { %v1166_v4 = vmul.f32 %v1692_v31, %v1165_v29 }
 0x5c3   :  { %v1186_v7 = vmul.f32 %v1694_v40, %v1185_v18 }
 0x5c4   :  { %v1167_v52 = vadd.f32 %v1692_v31, %v1166_v4 }
 0x5c5   :  { %v1187_v13 = vadd.f32 %v1694_v40, %v1186_v7 }
 0x5c6   :  { %v1171_v10 = vsel %vm1170_vm10, %v1692_v31, %v1167_v52 }
 0x5c7   :  { %v1176_v26 = vsel %vm1173_vm11, %v1175_v37, %v1171_v10  ;;  %v1191_v34 = vsel %vm1190_vm14, %v1694_v40, %v1187_v13 }
 0x5c8   :  { %v1199_v55 = vmul.f32 %v1198_v23, %v1176_v26  ;;  %v1196_v36 = vsel %vm1193_vm15, %v1195_v24, %v1191_v34 }
 0x5ca   :  { %v1200_v1 = vadd.f32 %v1199_v55, %v344_v38 }
 0x5cc   :  { %1695 = vtanh.f32 %v1200_v1 }
 0x5d2   :  { %v1696_v17 = vpop.eup %1695 }
 0x5d3   :  { %v1202_v8 = vsub.f32 %v2173_v2, %v1696_v17 }
 0x5d5   :  { %v1203_v47 = vmul.f32 %v1202_v8, %v1196_v36 }
 0x5d7   :  { %v1204_v49 = vadd.f32 %v1696_v17, %v1203_v47 }
 0x5d9   :  { %v1205_v41 = vpack.c.bf16 %v1204_v49, %v1204_v49 }
 0x5db   :  { %1282 = vmatmul.bf16.vlgmr.msra.gmra.mxu2 %v1205_v41 }
 0x65e   :  { %v1283_v30 = vpop.f32.mrf.mxu2 }
 0x65f   :  { %v1284_v59 = vadd.f32 %v1616_v15, %v1283_v30 }
 0x661   :  { %1287 = vst [vmem:[%s2223_s7] sm:$0xff] %v1284_v59 }
 0x666   :  { %v1285_v45 = vpop.f32.mrf.mxu2 }
 0x667   :  { %1292 = vsyncpa [#allocation3], 1 }
 0x668   :  { %1293 = vsyncpa [#allocation5], 1 }

</bundles_post_ra>
